<compile_context>
chip_gen: v7x
topology: tpu7x:2x2x1
jax: 0.10.0
libtpu: 0.0.40
codegen_flags: <defaults>
</compile_context>

<pallas_src>
import functools
import math

import jax
import jax.numpy as jnp
from jax.experimental import pallas as pl
from jax.experimental.pallas import tpu as pltpu

# ------------------------- small synthetic config -------------------------
B = 2                      # batch
IN_CH = 3                  # RGB input channels
IMG = 16                   # image height == width
PATCH = 8                  # patch / stride size
N_PATCH = (IMG // PATCH) ** 2      # 4 patches
SEQ = N_PATCH + 1                  # +1 cls token -> 5 tokens
EMBED = 32                 # small stand-in for self.in_planes (=768 in paper)
HEADS = 4
HEAD_DIM = EMBED // HEADS
MLP_HIDDEN = EMBED * 4
DEPTH = 2
NUM_CLASSES = 10
NUM_CLASSES_PAD = 128      # lane-dense classifier output (unmasked vst), sliced to 10
CAMERA_NUM = 3             # SIE camera embeddings
SIE_COE = 3.0              # cfg.MODEL.SIE_COE
PATCH_DIM = IN_CH * PATCH * PATCH


# ------------------------------ in-kernel helpers ---------------------------
def _layernorm(x, g, b, eps=1e-6):
    # f32 elementwise math (v5e VPU/EUP have no bf16 path)
    mu = jnp.mean(x, axis=-1, keepdims=True)
    var = jnp.mean(jnp.square(x - mu), axis=-1, keepdims=True)
    return (x - mu) * jax.lax.rsqrt(var + eps) * g + b


def _bf16_matmul(x, w):
    # bf16 MXU operands, f32 accumulation (v5e/v6e/v7x MXU peak needs bf16 inputs)
    return jnp.dot(x.astype(jnp.bfloat16), w.astype(jnp.bfloat16),
                   preferred_element_type=jnp.float32)


def _rep_spec(shape):
    """Full-array block whose index ignores the 1-D grid (weights / biases)."""
    zeros = (0,) * len(shape)
    return pl.BlockSpec(shape, lambda b: zeros)


# ------------------------------ Pallas kernels -----------------------------
def _embed_kernel(p_ref, w_ref, b_ref, cls_ref, pos_ref, sie_ref, o_ref):
    # One batch element per grid step.
    # p: (N_PATCH, PATCH_DIM), w: (PATCH_DIM, EMBED), b/cls/sie: (1, EMBED),
    # pos: (SEQ, EMBED), o: (SEQ, EMBED)
    tok = _bf16_matmul(p_ref[...], w_ref[...]) + b_ref[...]        # (N_PATCH, EMBED)
    pos = pos_ref[...]
    sie = SIE_COE * sie_ref[...]                                   # SIE camera term
    o_ref[0:1, :] = cls_ref[...] + pos[0:1, :] + sie               # cls token row
    o_ref[1:, :] = tok + pos[1:, :] + sie                          # patch tokens


def _block_kernel(h_ref, ln1g_ref, ln1b_ref, qkvw_ref, qkvb_ref,
                  projw_ref, projb_ref, ln2g_ref, ln2b_ref,
                  fc1w_ref, fc1b_ref, fc2w_ref, fc2b_ref, o_ref):
    # Whole transformer block fused; one batch element per grid step.
    x = h_ref[...]                                                 # (SEQ, EMBED) f32

    # --- attention sub-block (pre-LN) ---
    y = _layernorm(x, ln1g_ref[...], ln1b_ref[...])
    qkv = _bf16_matmul(y, qkvw_ref[...]) + qkvb_ref[...]           # (SEQ, 3*EMBED)
    scale = 1.0 / math.sqrt(HEAD_DIM)
    heads = []
    for hd in range(HEADS):                                        # unrolled, HEADS=4
        lo = hd * HEAD_DIM
        q = qkv[:, lo:lo + HEAD_DIM]
        k = qkv[:, EMBED + lo:EMBED + lo + HEAD_DIM]
        v = qkv[:, 2 * EMBED + lo:2 * EMBED + lo + HEAD_DIM]
        s = jax.lax.dot_general(q, k, (((1,), (1,)), ((), ())),
                                preferred_element_type=jnp.float32) * scale
        s = s - jnp.max(s, axis=-1, keepdims=True)
        p = jnp.exp(s)                                             # f32 softmax
        p = p * pl.reciprocal(jnp.sum(p, axis=-1, keepdims=True), approx=True)
        heads.append(jnp.dot(p, v, preferred_element_type=jnp.float32))
    a = jnp.concatenate(heads, axis=-1)                            # (SEQ, EMBED)
    x = x + _bf16_matmul(a, projw_ref[...]) + projb_ref[...]

    # --- MLP sub-block (pre-LN) ---
    y = _layernorm(x, ln2g_ref[...], ln2b_ref[...])
    hdn = _bf16_matmul(y, fc1w_ref[...]) + fc1b_ref[...]
    # TODO(synk): nn.GELU default is exact erf; tanh approximation used (EUP path).
    hdn = jax.nn.gelu(hdn, approximate=True)
    x = x + _bf16_matmul(hdn, fc2w_ref[...]) + fc2b_ref[...]

    o_ref[...] = x


def _head_kernel(x_ref, lng_ref, lnb_ref, bng_ref, bnb_ref, clsw_ref,
                 gf_ref, score_ref):
    # Final backbone LN on the cls row only + BatchNorm1d bottleneck + classifier.
    x = x_ref[...]                                                 # (B, EMBED)
    gf = _layernorm(x, lng_ref[...], lnb_ref[...])                 # global_feat
    gf_ref[...] = gf
    # BatchNorm1d training mode: biased batch statistics over the batch axis.
    # (running-stat updates not modeled — pure forward)
    mu = jnp.mean(gf, axis=0, keepdims=True)
    var = jnp.mean(jnp.square(gf - mu), axis=0, keepdims=True)
    feat = (gf - mu) * jax.lax.rsqrt(var + 1e-5) * bng_ref[...] + bnb_ref[...]
    # classifier: Linear(in_planes, num_classes, bias=False), padded to 128 lanes
    score_ref[...] = _bf16_matmul(feat, clsw_ref[...])             # (B, NUM_CLASSES_PAD)


# ------------------------------ kernel wrappers ----------------------------
def pallas_embed(patches, pw, pb, cls_tok, pos, sie):
    # patches: (B, N_PATCH, PATCH_DIM); sie: (B, 1, EMBED) (pre-gathered by cam_label)
    return pl.pallas_call(
        _embed_kernel,
        grid=(B,),
        in_specs=[
            pl.BlockSpec((None, N_PATCH, PATCH_DIM), lambda b: (b, 0, 0)),
            _rep_spec((PATCH_DIM, EMBED)),
            _rep_spec((1, EMBED)),
            _rep_spec((1, EMBED)),
            _rep_spec((SEQ, EMBED)),
            pl.BlockSpec((None, 1, EMBED), lambda b: (b, 0, 0)),
        ],
        out_specs=pl.BlockSpec((None, SEQ, EMBED), lambda b: (b, 0, 0)),
        out_shape=jax.ShapeDtypeStruct((B, SEQ, EMBED), jnp.float32),
        compiler_params=pltpu.CompilerParams(dimension_semantics=("parallel",)),
    )(patches, pw, pb, cls_tok, pos, sie)


def pallas_block(h, blk):
    # TODO(synk): at paper sizes (EMBED=768, SEQ~211, real batch) this fused block
    # needs a tiled grid (M/N/K, f32 VMEM accumulator, K last + "arbitrary"),
    # bf16 weight streaming with pipeline_mode=pl.Buffered(3), and tile sizes
    # re-derived for v7x's 64 MiB VMEM; at the synthetic size full blocks fit VMEM.
    ws = [blk['ln1_g'], blk['ln1_b'], blk['qkv_w'], blk['qkv_b'],
          blk['proj_w'], blk['proj_b'], blk['ln2_g'], blk['ln2_b'],
          blk['fc1_w'], blk['fc1_b'], blk['fc2_w'], blk['fc2_b']]
    in_specs = [pl.BlockSpec((None, SEQ, EMBED), lambda b: (b, 0, 0))]
    in_specs += [_rep_spec(w.shape) for w in ws]
    return pl.pallas_call(
        _block_kernel,
        grid=(B,),
        in_specs=in_specs,
        out_specs=pl.BlockSpec((None, SEQ, EMBED), lambda b: (b, 0, 0)),
        out_shape=jax.ShapeDtypeStruct((B, SEQ, EMBED), jnp.float32),
        compiler_params=pltpu.CompilerParams(dimension_semantics=("parallel",)),
    )(h, *ws)


def pallas_head(cls_tok, lng, lnb, bng, bnb, clsw):
    return pl.pallas_call(
        _head_kernel,
        grid=(1,),
        in_specs=[
            pl.BlockSpec((B, EMBED), lambda i: (0, 0)),
            pl.BlockSpec((1, EMBED), lambda i: (0, 0)),
            pl.BlockSpec((1, EMBED), lambda i: (0, 0)),
            pl.BlockSpec((1, EMBED), lambda i: (0, 0)),
            pl.BlockSpec((1, EMBED), lambda i: (0, 0)),
            pl.BlockSpec((EMBED, NUM_CLASSES_PAD), lambda i: (0, 0)),
        ],
        out_specs=(
            pl.BlockSpec((B, EMBED), lambda i: (0, 0)),
            pl.BlockSpec((B, NUM_CLASSES_PAD), lambda i: (0, 0)),
        ),
        out_shape=(
            jax.ShapeDtypeStruct((B, EMBED), jnp.float32),
            jax.ShapeDtypeStruct((B, NUM_CLASSES_PAD), jnp.float32),
        ),
    )(cls_tok, lng, lnb, bng, bnb, clsw)


# --------------------------- parameter construction ------------------------
def init_params(key):
    ks = iter(jax.random.split(key, 8 + DEPTH * 8))

    def nrm(shape, std):
        return std * jax.random.normal(next(ks), shape, dtype=jnp.float32)

    # classifier Linear(in_planes, num_classes, bias=False), std=0.001,
    # zero-padded to 128 output lanes (padded columns are sliced away outside).
    cls_w = nrm((EMBED, NUM_CLASSES), 0.001)
    cls_w_pad = jnp.zeros((EMBED, NUM_CLASSES_PAD), jnp.float32)
    cls_w_pad = cls_w_pad.at[:, :NUM_CLASSES].set(cls_w)

    params = {
        # patch-embed Conv2d(EMBED, IN_CH, PATCH, PATCH) flattened to a matmul
        'patch_w': nrm((PATCH_DIM, EMBED), 0.02),
        'patch_b': jnp.zeros((1, EMBED), jnp.float32),
        'cls_token': nrm((1, EMBED), 0.02),
        'pos_embed': nrm((SEQ, EMBED), 0.02),
        'sie_embed': nrm((CAMERA_NUM, EMBED), 0.02),     # SIE camera embed
        'ln_g': jnp.ones((1, EMBED), jnp.float32),
        'ln_b': jnp.zeros((1, EMBED), jnp.float32),
        # bottleneck BatchNorm1d: weights_init_kaiming -> weight=1, bias=0
        'bn_g': jnp.ones((1, EMBED), jnp.float32),
        'bn_b': jnp.zeros((1, EMBED), jnp.float32),
        'cls_w': cls_w_pad,
        'blocks': [],
    }
    for _ in range(DEPTH):
        params['blocks'].append({
            'ln1_g': jnp.ones((1, EMBED), jnp.float32),
            'ln1_b': jnp.zeros((1, EMBED), jnp.float32),
            'qkv_w': nrm((EMBED, 3 * EMBED), 0.02),
            'qkv_b': jnp.zeros((1, 3 * EMBED), jnp.float32),
            'proj_w': nrm((EMBED, EMBED), 0.02),
            'proj_b': jnp.zeros((1, EMBED), jnp.float32),
            'ln2_g': jnp.ones((1, EMBED), jnp.float32),
            'ln2_b': jnp.zeros((1, EMBED), jnp.float32),
            'fc1_w': nrm((EMBED, MLP_HIDDEN), 0.02),
            'fc1_b': jnp.zeros((1, MLP_HIDDEN), jnp.float32),
            'fc2_w': nrm((MLP_HIDDEN, EMBED), 0.02),
            'fc2_b': jnp.zeros((1, EMBED), jnp.float32),
        })
    return params


# --------------------------------- forward ---------------------------------
def build_transformer_forward(params, x, cam_label, training=True):
    # layout: x is NCHW (B, C, H, W), same as the PyTorch module.
    Bx, C, H, W = x.shape
    gh, gw = H // PATCH, W // PATCH

    # patch embedding (Conv2d k=s=PATCH) as exact unfold; layout prep only (XLA).
    patches = x.reshape(Bx, C, gh, PATCH, gw, PATCH)
    patches = patches.transpose(0, 2, 4, 1, 3, 5).reshape(Bx, gh * gw, C * PATCH * PATCH)

    # TODO(synk): at real sizes pass cam_label via PrefetchScalarGridSpec and pick
    # the sie_embed row in the index_map; here the (B, EMBED) gather is negligible.
    sie = (params['sie_embed'][cam_label])[:, None, :]            # (B, 1, EMBED)

    # fused patch-embed + cls token + pos_embed + SIE add -> (B, SEQ, EMBED)
    h = pallas_embed(patches, params['patch_w'], params['patch_b'],
                     params['cls_token'], params['pos_embed'], sie)

    # one fused Pallas kernel per transformer block
    for blk in params['blocks']:
        h = pallas_block(h, blk)

    # final LN applied to the cls-token row only, fused with BN + classifier
    cls_tok = h[:, 0, :]                                          # (B, EMBED)
    global_feat, score_pad = pallas_head(cls_tok, params['ln_g'], params['ln_b'],
                                         params['bn_g'], params['bn_b'],
                                         params['cls_w'])

    if training:
        cls_score = score_pad[:, :NUM_CLASSES]                    # drop lane padding
        return cls_score, global_feat
    # eval path, neck_feat == 'before'
    return global_feat


# ----------------------------------- main -----------------------------------
if __name__ == "__main__":
    key = jax.random.PRNGKey(0)
    pkey, xkey = jax.random.split(key)
    params = init_params(pkey)

    x = jax.random.normal(xkey, (B, IN_CH, IMG, IMG), dtype=jnp.float32)
    cam_label = jnp.array([0, 1], dtype=jnp.int32)

    fwd = jax.jit(functools.partial(build_transformer_forward, training=True))
    cls_score, global_feat = fwd(params, x, cam_label)
    jax.block_until_ready((cls_score, global_feat))

    assert cls_score.shape == (B, NUM_CLASSES)
    assert global_feat.shape == (B, EMBED)
    assert jnp.all(jnp.isfinite(cls_score)) and jnp.all(jnp.isfinite(global_feat))
    print("KERNEL_OK")
</pallas_src>

<mosaic_0001>
module attributes {stable_mosaic.version = 11 : i64} {
  func.func @_embed_kernel(%arg0: i32, %arg1: memref<1x4x192xf32, #tpu.memory_space<vmem>>, %arg2: memref<192x32xf32, #tpu.memory_space<vmem>>, %arg3: memref<1x32xf32, #tpu.memory_space<vmem>>, %arg4: memref<1x32xf32, #tpu.memory_space<vmem>>, %arg5: memref<5x32xf32, #tpu.memory_space<vmem>>, %arg6: memref<1x1x32xf32, #tpu.memory_space<vmem>>, %arg7: memref<1x5x32xf32, #tpu.memory_space<vmem>>) attributes {dimension_semantics = [#tpu.dimension_semantics<parallel>], iteration_bounds = array<i64: 2>, scalar_prefetch = 0 : i64, scratch_operands = 0 : i64, tpu.core_type = #tpu.core_type<tc>, window_params = [{transform_indices = @transform_0, window_bounds = array<i64: 1, 4, 192>}, {pipeline_mode = #tpu.pipeline_mode<synchronous>, transform_indices = @transform_1, window_bounds = array<i64: 192, 32>}, {pipeline_mode = #tpu.pipeline_mode<synchronous>, transform_indices = @transform_2, window_bounds = array<i64: 1, 32>}, {pipeline_mode = #tpu.pipeline_mode<synchronous>, transform_indices = @transform_3, window_bounds = array<i64: 1, 32>}, {pipeline_mode = #tpu.pipeline_mode<synchronous>, transform_indices = @transform_4, window_bounds = array<i64: 5, 32>}, {transform_indices = @transform_5, window_bounds = array<i64: 1, 1, 32>}, {transform_indices = @transform_6, window_bounds = array<i64: 1, 5, 32>}]} {
    %c0 = arith.constant 0 : index
    %c0_0 = arith.constant 0 : index
    %c0_1 = arith.constant 0 : index
    %0 = vector.load %arg1[%c0, %c0_0, %c0_1] : memref<1x4x192xf32, #tpu.memory_space<vmem>>, vector<1x4x192xf32>
    %1 = vector.shape_cast %0 : vector<1x4x192xf32> to vector<4x192xf32>
    %c0_2 = arith.constant 0 : index
    %c0_3 = arith.constant 0 : index
    %2 = vector.load %arg2[%c0_2, %c0_3] : memref<192x32xf32, #tpu.memory_space<vmem>>, vector<192x32xf32>
    %3 = arith.truncf %1 : vector<4x192xf32> to vector<4x192xbf16>
    %4 = arith.truncf %2 : vector<192x32xf32> to vector<192x32xbf16>
    %cst = arith.constant dense<0.000000e+00> : vector<4x32xf32>
    %5 = tpu.matmul %3, %4, %cst {dimension_numbers = #tpu.dot_dimension_numbers<[1], [0], [0], [1], [0, 0, 1, 1], [], []>} : vector<4x192xbf16>, vector<192x32xbf16>, vector<4x32xf32> -> vector<4x32xf32>
    %c0_4 = arith.constant 0 : index
    %c0_5 = arith.constant 0 : index
    %6 = vector.load %arg3[%c0_4, %c0_5] : memref<1x32xf32, #tpu.memory_space<vmem>>, vector<1x32xf32>
    %7 = vector.broadcast %6 : vector<1x32xf32> to vector<4x32xf32>
    %8 = arith.addf %5, %7 : vector<4x32xf32>
    %c0_6 = arith.constant 0 : index
    %c0_7 = arith.constant 0 : index
    %9 = vector.load %arg5[%c0_6, %c0_7] : memref<5x32xf32, #tpu.memory_space<vmem>>, vector<5x32xf32>
    %c0_8 = arith.constant 0 : index
    %c0_9 = arith.constant 0 : index
    %c0_10 = arith.constant 0 : index
    %10 = vector.load %arg6[%c0_8, %c0_9, %c0_10] : memref<1x1x32xf32, #tpu.memory_space<vmem>>, vector<1x1x32xf32>
    %11 = vector.shape_cast %10 : vector<1x1x32xf32> to vector<1x32xf32>
    %cst_11 = arith.constant 3.000000e+00 : f32
    %12 = vector.broadcast %cst_11 : f32 to vector<1x32xf32>
    %13 = arith.mulf %12, %11 : vector<1x32xf32>
    %c0_12 = arith.constant 0 : index
    %c0_13 = arith.constant 0 : index
    %14 = vector.load %arg4[%c0_12, %c0_13] : memref<1x32xf32, #tpu.memory_space<vmem>>, vector<1x32xf32>
    %15 = vector.extract_strided_slice %9 {offsets = [0, 0], sizes = [1, 32], strides = [1, 1]} : vector<5x32xf32> to vector<1x32xf32>
    %16 = arith.addf %14, %15 : vector<1x32xf32>
    %17 = arith.addf %16, %13 : vector<1x32xf32>
    %c0_14 = arith.constant 0 : index
    %c0_15 = arith.constant 0 : index
    %c0_16 = arith.constant 0 : index
    %18 = vector.load %arg7[%c0_14, %c0_15, %c0_16] : memref<1x5x32xf32, #tpu.memory_space<vmem>>, vector<1x1x32xf32>
    %19 = vector.shape_cast %18 : vector<1x1x32xf32> to vector<1x32xf32>
    %20 = vector.shape_cast %17 : vector<1x32xf32> to vector<1x1x32xf32>
    tpu.vector_store %arg7[%c0_14, %c0_15, %c0_16], %20 {strides = array<i32>} : memref<1x5x32xf32, #tpu.memory_space<vmem>>, vector<1x1x32xf32>,
    %21 = vector.extract_strided_slice %9 {offsets = [1, 0], sizes = [4, 32], strides = [1, 1]} : vector<5x32xf32> to vector<4x32xf32>
    %22 = arith.addf %8, %21 : vector<4x32xf32>
    %23 = vector.broadcast %13 : vector<1x32xf32> to vector<4x32xf32>
    %24 = arith.addf %22, %23 : vector<4x32xf32>
    %c0_17 = arith.constant 0 : index
    %c1 = arith.constant 1 : index
    %c0_18 = arith.constant 0 : index
    %25 = vector.load %arg7[%c0_17, %c1, %c0_18] : memref<1x5x32xf32, #tpu.memory_space<vmem>>, vector<1x4x32xf32>
    %26 = vector.shape_cast %25 : vector<1x4x32xf32> to vector<4x32xf32>
    %27 = vector.shape_cast %24 : vector<4x32xf32> to vector<1x4x32xf32>
    tpu.vector_store %arg7[%c0_17, %c1, %c0_18], %27 {strides = array<i32>} : memref<1x5x32xf32, #tpu.memory_space<vmem>>, vector<1x4x32xf32>,
    return
  }
  func.func @transform_0(%arg0: i32) -> (i32, i32, i32) {
    %c0_i32 = arith.constant 0 : i32
    %c0_i32_0 = arith.constant 0 : i32
    %c0_i32_1 = arith.constant 0 : i32
    return %arg0, %c0_i32, %c0_i32_0 : i32, i32, i32
  }
  func.func @transform_1(%arg0: i32) -> (i32, i32) {
    %c0_i32 = arith.constant 0 : i32
    %c0_i32_0 = arith.constant 0 : i32
    %c0_i32_1 = arith.constant 0 : i32
    return %c0_i32, %c0_i32_0 : i32, i32
  }
  func.func @transform_2(%arg0: i32) -> (i32, i32) {
    %c0_i32 = arith.constant 0 : i32
    %c0_i32_0 = arith.constant 0 : i32
    %c0_i32_1 = arith.constant 0 : i32
    return %c0_i32, %c0_i32_0 : i32, i32
  }
  func.func @transform_3(%arg0: i32) -> (i32, i32) {
    %c0_i32 = arith.constant 0 : i32
    %c0_i32_0 = arith.constant 0 : i32
    %c0_i32_1 = arith.constant 0 : i32
    return %c0_i32, %c0_i32_0 : i32, i32
  }
  func.func @transform_4(%arg0: i32) -> (i32, i32) {
    %c0_i32 = arith.constant 0 : i32
    %c0_i32_0 = arith.constant 0 : i32
    %c0_i32_1 = arith.constant 0 : i32
    return %c0_i32, %c0_i32_0 : i32, i32
  }
  func.func @transform_5(%arg0: i32) -> (i32, i32, i32) {
    %c0_i32 = arith.constant 0 : i32
    %c0_i32_0 = arith.constant 0 : i32
    %c0_i32_1 = arith.constant 0 : i32
    return %arg0, %c0_i32, %c0_i32_0 : i32, i32, i32
  }
  func.func @transform_6(%arg0: i32) -> (i32, i32, i32) {
    %c0_i32 = arith.constant 0 : i32
    %c0_i32_0 = arith.constant 0 : i32
    %c0_i32_1 = arith.constant 0 : i32
    return %arg0, %c0_i32, %c0_i32_0 : i32, i32, i32
  }
}

module attributes {stable_mosaic.version = 11 : i64} {
  func.func @_head_kernel(%arg0: i32, %arg1: memref<2x32xf32, #tpu.memory_space<vmem>>, %arg2: memref<1x32xf32, #tpu.memory_space<vmem>>, %arg3: memref<1x32xf32, #tpu.memory_space<vmem>>, %arg4: memref<1x32xf32, #tpu.memory_space<vmem>>, %arg5: memref<1x32xf32, #tpu.memory_space<vmem>>, %arg6: memref<32x128xf32, #tpu.memory_space<vmem>>, %arg7: memref<2x32xf32, #tpu.memory_space<vmem>>, %arg8: memref<2x128xf32, #tpu.memory_space<vmem>>) attributes {dimension_semantics = [#tpu.dimension_semantics<arbitrary>], iteration_bounds = array<i64: 1>, scalar_prefetch = 0 : i64, scratch_operands = 0 : i64, tpu.core_type = #tpu.core_type<tc>, window_params = [{pipeline_mode = #tpu.pipeline_mode<synchronous>, transform_indices = @transform_0, window_bounds = array<i64: 2, 32>}, {pipeline_mode = #tpu.pipeline_mode<synchronous>, transform_indices = @transform_1, window_bounds = array<i64: 1, 32>}, {pipeline_mode = #tpu.pipeline_mode<synchronous>, transform_indices = @transform_2, window_bounds = array<i64: 1, 32>}, {pipeline_mode = #tpu.pipeline_mode<synchronous>, transform_indices = @transform_3, window_bounds = array<i64: 1, 32>}, {pipeline_mode = #tpu.pipeline_mode<synchronous>, transform_indices = @transform_4, window_bounds = array<i64: 1, 32>}, {pipeline_mode = #tpu.pipeline_mode<synchronous>, transform_indices = @transform_5, window_bounds = array<i64: 32, 128>}, {pipeline_mode = #tpu.pipeline_mode<synchronous>, transform_indices = @transform_6, window_bounds = array<i64: 2, 32>}, {pipeline_mode = #tpu.pipeline_mode<synchronous>, transform_indices = @transform_7, window_bounds = array<i64: 2, 128>}]} {
    %c0 = arith.constant 0 : index
    %c0_0 = arith.constant 0 : index
    %0 = vector.load %arg1[%c0, %c0_0] : memref<2x32xf32, #tpu.memory_space<vmem>>, vector<2x32xf32>
    %c0_1 = arith.constant 0 : index
    %c0_2 = arith.constant 0 : index
    %1 = vector.load %arg2[%c0_1, %c0_2] : memref<1x32xf32, #tpu.memory_space<vmem>>, vector<1x32xf32>
    %c0_3 = arith.constant 0 : index
    %c0_4 = arith.constant 0 : index
    %2 = vector.load %arg3[%c0_3, %c0_4] : memref<1x32xf32, #tpu.memory_space<vmem>>, vector<1x32xf32>
    %cst = arith.constant dense<0.000000e+00> : vector<2xf32>
    %3 = vector.multi_reduction <add>, %0, %cst [1] : vector<2x32xf32> to vector<2xf32>
    %4 = vector.shape_cast %3 : vector<2xf32> to vector<2x1xf32>
    %cst_5 = arith.constant 3.200000e+01 : f32
    %5 = vector.broadcast %cst_5 : f32 to vector<2x1xf32>
    %6 = arith.divf %4, %5 : vector<2x1xf32>
    %7 = vector.broadcast %6 : vector<2x1xf32> to vector<2x32xf32>
    %8 = arith.subf %0, %7 : vector<2x32xf32>
    %9 = arith.mulf %8, %8 : vector<2x32xf32>
    %cst_6 = arith.constant dense<0.000000e+00> : vector<2xf32>
    %10 = vector.multi_reduction <add>, %9, %cst_6 [1] : vector<2x32xf32> to vector<2xf32>
    %11 = vector.shape_cast %10 : vector<2xf32> to vector<2x1xf32>
    %cst_7 = arith.constant 3.200000e+01 : f32
    %12 = vector.broadcast %cst_7 : f32 to vector<2x1xf32>
    %13 = arith.divf %11, %12 : vector<2x1xf32>
    %14 = vector.broadcast %6 : vector<2x1xf32> to vector<2x32xf32>
    %15 = arith.subf %0, %14 : vector<2x32xf32>
    %cst_8 = arith.constant 9.99999997E-7 : f32
    %16 = vector.broadcast %cst_8 : f32 to vector<2x1xf32>
    %17 = arith.addf %13, %16 : vector<2x1xf32>
    %18 = math.rsqrt %17 : vector<2x1xf32>
    %19 = vector.broadcast %18 : vector<2x1xf32> to vector<2x32xf32>
    %20 = arith.mulf %15, %19 : vector<2x32xf32>
    %21 = vector.broadcast %1 : vector<1x32xf32> to vector<2x32xf32>
    %22 = arith.mulf %20, %21 : vector<2x32xf32>
    %23 = vector.broadcast %2 : vector<1x32xf32> to vector<2x32xf32>
    %24 = arith.addf %22, %23 : vector<2x32xf32>
    %c0_9 = arith.constant 0 : index
    %c0_10 = arith.constant 0 : index
    %25 = vector.load %arg7[%c0_9, %c0_10] : memref<2x32xf32, #tpu.memory_space<vmem>>, vector<2x32xf32>
    tpu.vector_store %arg7[%c0_9, %c0_10], %24 {strides = array<i32>} : memref<2x32xf32, #tpu.memory_space<vmem>>, vector<2x32xf32>,
    %cst_11 = arith.constant dense<0.000000e+00> : vector<32xf32>
    %26 = vector.multi_reduction <add>, %24, %cst_11 [0] : vector<2x32xf32> to vector<32xf32>
    %27 = vector.shape_cast %26 : vector<32xf32> to vector<1x32xf32>
    %cst_12 = arith.constant 2.000000e+00 : f32
    %28 = vector.broadcast %cst_12 : f32 to vector<1x32xf32>
    %29 = arith.divf %27, %28 : vector<1x32xf32>
    %30 = vector.broadcast %29 : vector<1x32xf32> to vector<2x32xf32>
    %31 = arith.subf %24, %30 : vector<2x32xf32>
    %32 = arith.mulf %31, %31 : vector<2x32xf32>
    %cst_13 = arith.constant dense<0.000000e+00> : vector<32xf32>
    %33 = vector.multi_reduction <add>, %32, %cst_13 [0] : vector<2x32xf32> to vector<32xf32>
    %34 = vector.shape_cast %33 : vector<32xf32> to vector<1x32xf32>
    %cst_14 = arith.constant 2.000000e+00 : f32
    %35 = vector.broadcast %cst_14 : f32 to vector<1x32xf32>
    %36 = arith.divf %34, %35 : vector<1x32xf32>
    %37 = vector.broadcast %29 : vector<1x32xf32> to vector<2x32xf32>
    %38 = arith.subf %24, %37 : vector<2x32xf32>
    %cst_15 = arith.constant 9.99999974E-6 : f32
    %39 = vector.broadcast %cst_15 : f32 to vector<1x32xf32>
    %40 = arith.addf %36, %39 : vector<1x32xf32>
    %41 = math.rsqrt %40 : vector<1x32xf32>
    %42 = vector.broadcast %41 : vector<1x32xf32> to vector<2x32xf32>
    %43 = arith.mulf %38, %42 : vector<2x32xf32>
    %c0_16 = arith.constant 0 : index
    %c0_17 = arith.constant 0 : index
    %44 = vector.load %arg4[%c0_16, %c0_17] : memref<1x32xf32, #tpu.memory_space<vmem>>, vector<1x32xf32>
    %45 = vector.broadcast %44 : vector<1x32xf32> to vector<2x32xf32>
    %46 = arith.mulf %43, %45 : vector<2x32xf32>
    %c0_18 = arith.constant 0 : index
    %c0_19 = arith.constant 0 : index
    %47 = vector.load %arg5[%c0_18, %c0_19] : memref<1x32xf32, #tpu.memory_space<vmem>>, vector<1x32xf32>
    %48 = vector.broadcast %47 : vector<1x32xf32> to vector<2x32xf32>
    %49 = arith.addf %46, %48 : vector<2x32xf32>
    %c0_20 = arith.constant 0 : index
    %c0_21 = arith.constant 0 : index
    %50 = vector.load %arg6[%c0_20, %c0_21] : memref<32x128xf32, #tpu.memory_space<vmem>>, vector<32x128xf32>
    %51 = arith.truncf %49 : vector<2x32xf32> to vector<2x32xbf16>
    %52 = arith.truncf %50 : vector<32x128xf32> to vector<32x128xbf16>
    %cst_22 = arith.constant dense<0.000000e+00> : vector<2x128xf32>
    %53 = tpu.matmul %51, %52, %cst_22 {dimension_numbers = #tpu.dot_dimension_numbers<[1], [0], [0], [1], [0, 0, 1, 1], [], []>} : vector<2x32xbf16>, vector<32x128xbf16>, vector<2x128xf32> -> vector<2x128xf32>
    %c0_23 = arith.constant 0 : index
    %c0_24 = arith.constant 0 : index
    %54 = vector.load %arg8[%c0_23, %c0_24] : memref<2x128xf32, #tpu.memory_space<vmem>>, vector<2x128xf32>
    tpu.vector_store %arg8[%c0_23, %c0_24], %53 {strides = array<i32>} : memref<2x128xf32, #tpu.memory_space<vmem>>, vector<2x128xf32>,
    return
  }
  func.func @transform_0(%arg0: i32) -> (i32, i32) {
    %c0_i32 = arith.constant 0 : i32
    %c0_i32_0 = arith.constant 0 : i32
    %c0_i32_1 = arith.constant 0 : i32
    return %c0_i32, %c0_i32_0 : i32, i32
  }
  func.func @transform_1(%arg0: i32) -> (i32, i32) {
    %c0_i32 = arith.constant 0 : i32
    %c0_i32_0 = arith.constant 0 : i32
    %c0_i32_1 = arith.constant 0 : i32
    return %c0_i32, %c0_i32_0 : i32, i32
  }
  func.func @transform_2(%arg0: i32) -> (i32, i32) {
    %c0_i32 = arith.constant 0 : i32
    %c0_i32_0 = arith.constant 0 : i32
    %c0_i32_1 = arith.constant 0 : i32
    return %c0_i32, %c0_i32_0 : i32, i32
  }
  func.func @transform_3(%arg0: i32) -> (i32, i32) {
    %c0_i32 = arith.constant 0 : i32
    %c0_i32_0 = arith.constant 0 : i32
    %c0_i32_1 = arith.constant 0 : i32
    return %c0_i32, %c0_i32_0 : i32, i32
  }
  func.func @transform_4(%arg0: i32) -> (i32, i32) {
    %c0_i32 = arith.constant 0 : i32
    %c0_i32_0 = arith.constant 0 : i32
    %c0_i32_1 = arith.constant 0 : i32
    return %c0_i32, %c0_i32_0 : i32, i32
  }
  func.func @transform_5(%arg0: i32) -> (i32, i32) {
    %c0_i32 = arith.constant 0 : i32
    %c0_i32_0 = arith.constant 0 : i32
    %c0_i32_1 = arith.constant 0 : i32
    return %c0_i32, %c0_i32_0 : i32, i32
  }
  func.func @transform_6(%arg0: i32) -> (i32, i32) {
    %c0_i32 = arith.constant 0 : i32
    %c0_i32_0 = arith.constant 0 : i32
    %c0_i32_1 = arith.constant 0 : i32
    return %c0_i32, %c0_i32_0 : i32, i32
  }
  func.func @transform_7(%arg0: i32) -> (i32, i32) {
    %c0_i32 = arith.constant 0 : i32
    %c0_i32_0 = arith.constant 0 : i32
    %c0_i32_1 = arith.constant 0 : i32
    return %c0_i32, %c0_i32_0 : i32, i32
  }
}

module attributes {stable_mosaic.version = 11 : i64} {
  func.func @_block_kernel(%arg0: i32, %arg1: memref<1x5x32xf32, #tpu.memory_space<vmem>>, %arg2: memref<1x32xf32, #tpu.memory_space<vmem>>, %arg3: memref<1x32xf32, #tpu.memory_space<vmem>>, %arg4: memref<32x96xf32, #tpu.memory_space<vmem>>, %arg5: memref<1x96xf32, #tpu.memory_space<vmem>>, %arg6: memref<32x32xf32, #tpu.memory_space<vmem>>, %arg7: memref<1x32xf32, #tpu.memory_space<vmem>>, %arg8: memref<1x32xf32, #tpu.memory_space<vmem>>, %arg9: memref<1x32xf32, #tpu.memory_space<vmem>>, %arg10: memref<32x128xf32, #tpu.memory_space<vmem>>, %arg11: memref<1x128xf32, #tpu.memory_space<vmem>>, %arg12: memref<128x32xf32, #tpu.memory_space<vmem>>, %arg13: memref<1x32xf32, #tpu.memory_space<vmem>>, %arg14: memref<1x5x32xf32, #tpu.memory_space<vmem>>) attributes {dimension_semantics = [#tpu.dimension_semantics<parallel>], iteration_bounds = array<i64: 2>, scalar_prefetch = 0 : i64, scratch_operands = 0 : i64, tpu.core_type = #tpu.core_type<tc>, window_params = [{transform_indices = @transform_0, window_bounds = array<i64: 1, 5, 32>}, {pipeline_mode = #tpu.pipeline_mode<synchronous>, transform_indices = @transform_1, window_bounds = array<i64: 1, 32>}, {pipeline_mode = #tpu.pipeline_mode<synchronous>, transform_indices = @transform_2, window_bounds = array<i64: 1, 32>}, {pipeline_mode = #tpu.pipeline_mode<synchronous>, transform_indices = @transform_3, window_bounds = array<i64: 32, 96>}, {pipeline_mode = #tpu.pipeline_mode<synchronous>, transform_indices = @transform_4, window_bounds = array<i64: 1, 96>}, {pipeline_mode = #tpu.pipeline_mode<synchronous>, transform_indices = @transform_5, window_bounds = array<i64: 32, 32>}, {pipeline_mode = #tpu.pipeline_mode<synchronous>, transform_indices = @transform_6, window_bounds = array<i64: 1, 32>}, {pipeline_mode = #tpu.pipeline_mode<synchronous>, transform_indices = @transform_7, window_bounds = array<i64: 1, 32>}, {pipeline_mode = #tpu.pipeline_mode<synchronous>, transform_indices = @transform_8, window_bounds = array<i64: 1, 32>}, {pipeline_mode = #tpu.pipeline_mode<synchronous>, transform_indices = @transform_9, window_bounds = array<i64: 32, 128>}, {pipeline_mode = #tpu.pipeline_mode<synchronous>, transform_indices = @transform_10, window_bounds = array<i64: 1, 128>}, {pipeline_mode = #tpu.pipeline_mode<synchronous>, transform_indices = @transform_11, window_bounds = array<i64: 128, 32>}, {pipeline_mode = #tpu.pipeline_mode<synchronous>, transform_indices = @transform_12, window_bounds = array<i64: 1, 32>}, {transform_indices = @transform_13, window_bounds = array<i64: 1, 5, 32>}]} {
    %c0 = arith.constant 0 : index
    %c0_0 = arith.constant 0 : index
    %c0_1 = arith.constant 0 : index
    %0 = vector.load %arg1[%c0, %c0_0, %c0_1] : memref<1x5x32xf32, #tpu.memory_space<vmem>>, vector<1x5x32xf32>
    %1 = vector.shape_cast %0 : vector<1x5x32xf32> to vector<5x32xf32>
    %c0_2 = arith.constant 0 : index
    %c0_3 = arith.constant 0 : index
    %2 = vector.load %arg2[%c0_2, %c0_3] : memref<1x32xf32, #tpu.memory_space<vmem>>, vector<1x32xf32>
    %c0_4 = arith.constant 0 : index
    %c0_5 = arith.constant 0 : index
    %3 = vector.load %arg3[%c0_4, %c0_5] : memref<1x32xf32, #tpu.memory_space<vmem>>, vector<1x32xf32>
    %cst = arith.constant dense<0.000000e+00> : vector<5xf32>
    %4 = vector.multi_reduction <add>, %1, %cst [1] : vector<5x32xf32> to vector<5xf32>
    %5 = vector.shape_cast %4 : vector<5xf32> to vector<5x1xf32>
    %cst_6 = arith.constant 3.200000e+01 : f32
    %6 = vector.broadcast %cst_6 : f32 to vector<5x1xf32>
    %7 = arith.divf %5, %6 : vector<5x1xf32>
    %8 = vector.broadcast %7 : vector<5x1xf32> to vector<5x32xf32>
    %9 = arith.subf %1, %8 : vector<5x32xf32>
    %10 = arith.mulf %9, %9 : vector<5x32xf32>
    %cst_7 = arith.constant dense<0.000000e+00> : vector<5xf32>
    %11 = vector.multi_reduction <add>, %10, %cst_7 [1] : vector<5x32xf32> to vector<5xf32>
    %12 = vector.shape_cast %11 : vector<5xf32> to vector<5x1xf32>
    %cst_8 = arith.constant 3.200000e+01 : f32
    %13 = vector.broadcast %cst_8 : f32 to vector<5x1xf32>
    %14 = arith.divf %12, %13 : vector<5x1xf32>
    %15 = vector.broadcast %7 : vector<5x1xf32> to vector<5x32xf32>
    %16 = arith.subf %1, %15 : vector<5x32xf32>
    %cst_9 = arith.constant 9.99999997E-7 : f32
    %17 = vector.broadcast %cst_9 : f32 to vector<5x1xf32>
    %18 = arith.addf %14, %17 : vector<5x1xf32>
    %19 = math.rsqrt %18 : vector<5x1xf32>
    %20 = vector.broadcast %19 : vector<5x1xf32> to vector<5x32xf32>
    %21 = arith.mulf %16, %20 : vector<5x32xf32>
    %22 = vector.broadcast %2 : vector<1x32xf32> to vector<5x32xf32>
    %23 = arith.mulf %21, %22 : vector<5x32xf32>
    %24 = vector.broadcast %3 : vector<1x32xf32> to vector<5x32xf32>
    %25 = arith.addf %23, %24 : vector<5x32xf32>
    %c0_10 = arith.constant 0 : index
    %c0_11 = arith.constant 0 : index
    %26 = vector.load %arg4[%c0_10, %c0_11] : memref<32x96xf32, #tpu.memory_space<vmem>>, vector<32x96xf32>
    %27 = arith.truncf %25 : vector<5x32xf32> to vector<5x32xbf16>
    %28 = arith.truncf %26 : vector<32x96xf32> to vector<32x96xbf16>
    %cst_12 = arith.constant dense<0.000000e+00> : vector<5x96xf32>
    %29 = tpu.matmul %27, %28, %cst_12 {dimension_numbers = #tpu.dot_dimension_numbers<[1], [0], [0], [1], [0, 0, 1, 1], [], []>} : vector<5x32xbf16>, vector<32x96xbf16>, vector<5x96xf32> -> vector<5x96xf32>
    %c0_13 = arith.constant 0 : index
    %c0_14 = arith.constant 0 : index
    %30 = vector.load %arg5[%c0_13, %c0_14] : memref<1x96xf32, #tpu.memory_space<vmem>>, vector<1x96xf32>
    %31 = vector.broadcast %30 : vector<1x96xf32> to vector<5x96xf32>
    %32 = arith.addf %29, %31 : vector<5x96xf32>
    %33 = vector.extract_strided_slice %32 {offsets = [0, 0], sizes = [5, 8], strides = [1, 1]} : vector<5x96xf32> to vector<5x8xf32>
    %34 = vector.extract_strided_slice %32 {offsets = [0, 32], sizes = [5, 8], strides = [1, 1]} : vector<5x96xf32> to vector<5x8xf32>
    %35 = vector.extract_strided_slice %32 {offsets = [0, 64], sizes = [5, 8], strides = [1, 1]} : vector<5x96xf32> to vector<5x8xf32>
    %cst_15 = arith.constant dense<0.000000e+00> : vector<5x5xf32>
    %36 = tpu.matmul %33, %34, %cst_15 {dimension_numbers = #tpu.dot_dimension_numbers<[1], [1], [0], [0], [0, 0, 1, 0], [], []>} : vector<5x8xf32>, vector<5x8xf32>, vector<5x5xf32> -> vector<5x5xf32>
    %cst_16 = arith.constant 0.353553385 : f32
    %37 = vector.broadcast %cst_16 : f32 to vector<5x5xf32>
    %38 = arith.mulf %36, %37 : vector<5x5xf32>
    %cst_17 = arith.constant dense<0xFF800000> : vector<5xf32>
    %39 = vector.multi_reduction <maximumf>, %38, %cst_17 [1] : vector<5x5xf32> to vector<5xf32>
    %40 = vector.shape_cast %39 : vector<5xf32> to vector<5x1xf32>
    %41 = vector.broadcast %40 : vector<5x1xf32> to vector<5x5xf32>
    %42 = arith.subf %38, %41 : vector<5x5xf32>
    %43 = math.exp %42 : vector<5x5xf32>
    %cst_18 = arith.constant dense<0.000000e+00> : vector<5xf32>
    %44 = vector.multi_reduction <add>, %43, %cst_18 [1] : vector<5x5xf32> to vector<5xf32>
    %45 = vector.shape_cast %44 : vector<5xf32> to vector<5x1xf32>
    %46 = tpu.reciprocal %45 {approx = true} : vector<5x1xf32> -> vector<5x1xf32>
    %47 = vector.broadcast %46 : vector<5x1xf32> to vector<5x5xf32>
    %48 = arith.mulf %43, %47 : vector<5x5xf32>
    %cst_19 = arith.constant dense<0.000000e+00> : vector<5x8xf32>
    %49 = tpu.matmul %48, %35, %cst_19 {dimension_numbers = #tpu.dot_dimension_numbers<[1], [0], [0], [1], [0, 0, 1, 1], [], []>} : vector<5x5xf32>, vector<5x8xf32>, vector<5x8xf32> -> vector<5x8xf32>
    %50 = vector.extract_strided_slice %32 {offsets = [0, 8], sizes = [5, 8], strides = [1, 1]} : vector<5x96xf32> to vector<5x8xf32>
    %51 = vector.extract_strided_slice %32 {offsets = [0, 40], sizes = [5, 8], strides = [1, 1]} : vector<5x96xf32> to vector<5x8xf32>
    %52 = vector.extract_strided_slice %32 {offsets = [0, 72], sizes = [5, 8], strides = [1, 1]} : vector<5x96xf32> to vector<5x8xf32>
    %cst_20 = arith.constant dense<0.000000e+00> : vector<5x5xf32>
    %53 = tpu.matmul %50, %51, %cst_20 {dimension_numbers = #tpu.dot_dimension_numbers<[1], [1], [0], [0], [0, 0, 1, 0], [], []>} : vector<5x8xf32>, vector<5x8xf32>, vector<5x5xf32> -> vector<5x5xf32>
    %cst_21 = arith.constant 0.353553385 : f32
    %54 = vector.broadcast %cst_21 : f32 to vector<5x5xf32>
    %55 = arith.mulf %53, %54 : vector<5x5xf32>
    %cst_22 = arith.constant dense<0xFF800000> : vector<5xf32>
    %56 = vector.multi_reduction <maximumf>, %55, %cst_22 [1] : vector<5x5xf32> to vector<5xf32>
    %57 = vector.shape_cast %56 : vector<5xf32> to vector<5x1xf32>
    %58 = vector.broadcast %57 : vector<5x1xf32> to vector<5x5xf32>
    %59 = arith.subf %55, %58 : vector<5x5xf32>
    %60 = math.exp %59 : vector<5x5xf32>
    %cst_23 = arith.constant dense<0.000000e+00> : vector<5xf32>
    %61 = vector.multi_reduction <add>, %60, %cst_23 [1] : vector<5x5xf32> to vector<5xf32>
    %62 = vector.shape_cast %61 : vector<5xf32> to vector<5x1xf32>
    %63 = tpu.reciprocal %62 {approx = true} : vector<5x1xf32> -> vector<5x1xf32>
    %64 = vector.broadcast %63 : vector<5x1xf32> to vector<5x5xf32>
    %65 = arith.mulf %60, %64 : vector<5x5xf32>
    %cst_24 = arith.constant dense<0.000000e+00> : vector<5x8xf32>
    %66 = tpu.matmul %65, %52, %cst_24 {dimension_numbers = #tpu.dot_dimension_numbers<[1], [0], [0], [1], [0, 0, 1, 1], [], []>} : vector<5x5xf32>, vector<5x8xf32>, vector<5x8xf32> -> vector<5x8xf32>
    %67 = vector.extract_strided_slice %32 {offsets = [0, 16], sizes = [5, 8], strides = [1, 1]} : vector<5x96xf32> to vector<5x8xf32>
    %68 = vector.extract_strided_slice %32 {offsets = [0, 48], sizes = [5, 8], strides = [1, 1]} : vector<5x96xf32> to vector<5x8xf32>
    %69 = vector.extract_strided_slice %32 {offsets = [0, 80], sizes = [5, 8], strides = [1, 1]} : vector<5x96xf32> to vector<5x8xf32>
    %cst_25 = arith.constant dense<0.000000e+00> : vector<5x5xf32>
    %70 = tpu.matmul %67, %68, %cst_25 {dimension_numbers = #tpu.dot_dimension_numbers<[1], [1], [0], [0], [0, 0, 1, 0], [], []>} : vector<5x8xf32>, vector<5x8xf32>, vector<5x5xf32> -> vector<5x5xf32>
    %cst_26 = arith.constant 0.353553385 : f32
    %71 = vector.broadcast %cst_26 : f32 to vector<5x5xf32>
    %72 = arith.mulf %70, %71 : vector<5x5xf32>
    %cst_27 = arith.constant dense<0xFF800000> : vector<5xf32>
    %73 = vector.multi_reduction <maximumf>, %72, %cst_27 [1] : vector<5x5xf32> to vector<5xf32>
    %74 = vector.shape_cast %73 : vector<5xf32> to vector<5x1xf32>
    %75 = vector.broadcast %74 : vector<5x1xf32> to vector<5x5xf32>
    %76 = arith.subf %72, %75 : vector<5x5xf32>
    %77 = math.exp %76 : vector<5x5xf32>
    %cst_28 = arith.constant dense<0.000000e+00> : vector<5xf32>
    %78 = vector.multi_reduction <add>, %77, %cst_28 [1] : vector<5x5xf32> to vector<5xf32>
    %79 = vector.shape_cast %78 : vector<5xf32> to vector<5x1xf32>
    %80 = tpu.reciprocal %79 {approx = true} : vector<5x1xf32> -> vector<5x1xf32>
    %81 = vector.broadcast %80 : vector<5x1xf32> to vector<5x5xf32>
    %82 = arith.mulf %77, %81 : vector<5x5xf32>
    %cst_29 = arith.constant dense<0.000000e+00> : vector<5x8xf32>
    %83 = tpu.matmul %82, %69, %cst_29 {dimension_numbers = #tpu.dot_dimension_numbers<[1], [0], [0], [1], [0, 0, 1, 1], [], []>} : vector<5x5xf32>, vector<5x8xf32>, vector<5x8xf32> -> vector<5x8xf32>
    %84 = vector.extract_strided_slice %32 {offsets = [0, 24], sizes = [5, 8], strides = [1, 1]} : vector<5x96xf32> to vector<5x8xf32>
    %85 = vector.extract_strided_slice %32 {offsets = [0, 56], sizes = [5, 8], strides = [1, 1]} : vector<5x96xf32> to vector<5x8xf32>
    %86 = vector.extract_strided_slice %32 {offsets = [0, 88], sizes = [5, 8], strides = [1, 1]} : vector<5x96xf32> to vector<5x8xf32>
    %cst_30 = arith.constant dense<0.000000e+00> : vector<5x5xf32>
    %87 = tpu.matmul %84, %85, %cst_30 {dimension_numbers = #tpu.dot_dimension_numbers<[1], [1], [0], [0], [0, 0, 1, 0], [], []>} : vector<5x8xf32>, vector<5x8xf32>, vector<5x5xf32> -> vector<5x5xf32>
    %cst_31 = arith.constant 0.353553385 : f32
    %88 = vector.broadcast %cst_31 : f32 to vector<5x5xf32>
    %89 = arith.mulf %87, %88 : vector<5x5xf32>
    %cst_32 = arith.constant dense<0xFF800000> : vector<5xf32>
    %90 = vector.multi_reduction <maximumf>, %89, %cst_32 [1] : vector<5x5xf32> to vector<5xf32>
    %91 = vector.shape_cast %90 : vector<5xf32> to vector<5x1xf32>
    %92 = vector.broadcast %91 : vector<5x1xf32> to vector<5x5xf32>
    %93 = arith.subf %89, %92 : vector<5x5xf32>
    %94 = math.exp %93 : vector<5x5xf32>
    %cst_33 = arith.constant dense<0.000000e+00> : vector<5xf32>
    %95 = vector.multi_reduction <add>, %94, %cst_33 [1] : vector<5x5xf32> to vector<5xf32>
    %96 = vector.shape_cast %95 : vector<5xf32> to vector<5x1xf32>
    %97 = tpu.reciprocal %96 {approx = true} : vector<5x1xf32> -> vector<5x1xf32>
    %98 = vector.broadcast %97 : vector<5x1xf32> to vector<5x5xf32>
    %99 = arith.mulf %94, %98 : vector<5x5xf32>
    %cst_34 = arith.constant dense<0.000000e+00> : vector<5x8xf32>
    %100 = tpu.matmul %99, %86, %cst_34 {dimension_numbers = #tpu.dot_dimension_numbers<[1], [0], [0], [1], [0, 0, 1, 1], [], []>} : vector<5x5xf32>, vector<5x8xf32>, vector<5x8xf32> -> vector<5x8xf32>
    %101 = tpu.concatenate %49, %66, %83, %100 in 1 : vector<5x8xf32>, vector<5x8xf32>, vector<5x8xf32>, vector<5x8xf32> -> vector<5x32xf32>
    %c0_35 = arith.constant 0 : index
    %c0_36 = arith.constant 0 : index
    %102 = vector.load %arg6[%c0_35, %c0_36] : memref<32x32xf32, #tpu.memory_space<vmem>>, vector<32x32xf32>
    %103 = arith.truncf %101 : vector<5x32xf32> to vector<5x32xbf16>
    %104 = arith.truncf %102 : vector<32x32xf32> to vector<32x32xbf16>
    %cst_37 = arith.constant dense<0.000000e+00> : vector<5x32xf32>
    %105 = tpu.matmul %103, %104, %cst_37 {dimension_numbers = #tpu.dot_dimension_numbers<[1], [0], [0], [1], [0, 0, 1, 1], [], []>} : vector<5x32xbf16>, vector<32x32xbf16>, vector<5x32xf32> -> vector<5x32xf32>
    %106 = arith.addf %1, %105 : vector<5x32xf32>
    %c0_38 = arith.constant 0 : index
    %c0_39 = arith.constant 0 : index
    %107 = vector.load %arg7[%c0_38, %c0_39] : memref<1x32xf32, #tpu.memory_space<vmem>>, vector<1x32xf32>
    %108 = vector.broadcast %107 : vector<1x32xf32> to vector<5x32xf32>
    %109 = arith.addf %106, %108 : vector<5x32xf32>
    %c0_40 = arith.constant 0 : index
    %c0_41 = arith.constant 0 : index
    %110 = vector.load %arg8[%c0_40, %c0_41] : memref<1x32xf32, #tpu.memory_space<vmem>>, vector<1x32xf32>
    %c0_42 = arith.constant 0 : index
    %c0_43 = arith.constant 0 : index
    %111 = vector.load %arg9[%c0_42, %c0_43] : memref<1x32xf32, #tpu.memory_space<vmem>>, vector<1x32xf32>
    %cst_44 = arith.constant dense<0.000000e+00> : vector<5xf32>
    %112 = vector.multi_reduction <add>, %109, %cst_44 [1] : vector<5x32xf32> to vector<5xf32>
    %113 = vector.shape_cast %112 : vector<5xf32> to vector<5x1xf32>
    %cst_45 = arith.constant 3.200000e+01 : f32
    %114 = vector.broadcast %cst_45 : f32 to vector<5x1xf32>
    %115 = arith.divf %113, %114 : vector<5x1xf32>
    %116 = vector.broadcast %115 : vector<5x1xf32> to vector<5x32xf32>
    %117 = arith.subf %109, %116 : vector<5x32xf32>
    %118 = arith.mulf %117, %117 : vector<5x32xf32>
    %cst_46 = arith.constant dense<0.000000e+00> : vector<5xf32>
    %119 = vector.multi_reduction <add>, %118, %cst_46 [1] : vector<5x32xf32> to vector<5xf32>
    %120 = vector.shape_cast %119 : vector<5xf32> to vector<5x1xf32>
    %cst_47 = arith.constant 3.200000e+01 : f32
    %121 = vector.broadcast %cst_47 : f32 to vector<5x1xf32>
    %122 = arith.divf %120, %121 : vector<5x1xf32>
    %123 = vector.broadcast %115 : vector<5x1xf32> to vector<5x32xf32>
    %124 = arith.subf %109, %123 : vector<5x32xf32>
    %cst_48 = arith.constant 9.99999997E-7 : f32
    %125 = vector.broadcast %cst_48 : f32 to vector<5x1xf32>
    %126 = arith.addf %122, %125 : vector<5x1xf32>
    %127 = math.rsqrt %126 : vector<5x1xf32>
    %128 = vector.broadcast %127 : vector<5x1xf32> to vector<5x32xf32>
    %129 = arith.mulf %124, %128 : vector<5x32xf32>
    %130 = vector.broadcast %110 : vector<1x32xf32> to vector<5x32xf32>
    %131 = arith.mulf %129, %130 : vector<5x32xf32>
    %132 = vector.broadcast %111 : vector<1x32xf32> to vector<5x32xf32>
    %133 = arith.addf %131, %132 : vector<5x32xf32>
    %c0_49 = arith.constant 0 : index
    %c0_50 = arith.constant 0 : index
    %134 = vector.load %arg10[%c0_49, %c0_50] : memref<32x128xf32, #tpu.memory_space<vmem>>, vector<32x128xf32>
    %135 = arith.truncf %133 : vector<5x32xf32> to vector<5x32xbf16>
    %136 = arith.truncf %134 : vector<32x128xf32> to vector<32x128xbf16>
    %cst_51 = arith.constant dense<0.000000e+00> : vector<5x128xf32>
    %137 = tpu.matmul %135, %136, %cst_51 {dimension_numbers = #tpu.dot_dimension_numbers<[1], [0], [0], [1], [0, 0, 1, 1], [], []>} : vector<5x32xbf16>, vector<32x128xbf16>, vector<5x128xf32> -> vector<5x128xf32>
    %c0_52 = arith.constant 0 : index
    %c0_53 = arith.constant 0 : index
    %138 = vector.load %arg11[%c0_52, %c0_53] : memref<1x128xf32, #tpu.memory_space<vmem>>, vector<1x128xf32>
    %139 = vector.broadcast %138 : vector<1x128xf32> to vector<5x128xf32>
    %140 = arith.addf %137, %139 : vector<5x128xf32>
    %141 = arith.mulf %140, %140 : vector<5x128xf32>
    %142 = arith.mulf %140, %141 : vector<5x128xf32>
    %cst_54 = arith.constant 4.471500e-02 : f32
    %143 = vector.broadcast %cst_54 : f32 to vector<5x128xf32>
    %144 = arith.mulf %143, %142 : vector<5x128xf32>
    %145 = arith.addf %140, %144 : vector<5x128xf32>
    %cst_55 = arith.constant 0.797884583 : f32
    %146 = vector.broadcast %cst_55 : f32 to vector<5x128xf32>
    %147 = arith.mulf %146, %145 : vector<5x128xf32>
    %148 = math.tanh %147 : vector<5x128xf32>
    %cst_56 = arith.constant 1.000000e+00 : f32
    %149 = vector.broadcast %cst_56 : f32 to vector<5x128xf32>
    %150 = arith.addf %149, %148 : vector<5x128xf32>
    %cst_57 = arith.constant 5.000000e-01 : f32
    %151 = vector.broadcast %cst_57 : f32 to vector<5x128xf32>
    %152 = arith.mulf %151, %150 : vector<5x128xf32>
    %153 = arith.mulf %140, %152 : vector<5x128xf32>
    %c0_58 = arith.constant 0 : index
    %c0_59 = arith.constant 0 : index
    %154 = vector.load %arg12[%c0_58, %c0_59] : memref<128x32xf32, #tpu.memory_space<vmem>>, vector<128x32xf32>
    %155 = arith.truncf %153 : vector<5x128xf32> to vector<5x128xbf16>
    %156 = arith.truncf %154 : vector<128x32xf32> to vector<128x32xbf16>
    %cst_60 = arith.constant dense<0.000000e+00> : vector<5x32xf32>
    %157 = tpu.matmul %155, %156, %cst_60 {dimension_numbers = #tpu.dot_dimension_numbers<[1], [0], [0], [1], [0, 0, 1, 1], [], []>} : vector<5x128xbf16>, vector<128x32xbf16>, vector<5x32xf32> -> vector<5x32xf32>
    %158 = arith.addf %109, %157 : vector<5x32xf32>
    %c0_61 = arith.constant 0 : index
    %c0_62 = arith.constant 0 : index
    %159 = vector.load %arg13[%c0_61, %c0_62] : memref<1x32xf32, #tpu.memory_space<vmem>>, vector<1x32xf32>
    %160 = vector.broadcast %159 : vector<1x32xf32> to vector<5x32xf32>
    %161 = arith.addf %158, %160 : vector<5x32xf32>
    %c0_63 = arith.constant 0 : index
    %c0_64 = arith.constant 0 : index
    %c0_65 = arith.constant 0 : index
    %162 = vector.load %arg14[%c0_63, %c0_64, %c0_65] : memref<1x5x32xf32, #tpu.memory_space<vmem>>, vector<1x5x32xf32>
    %163 = vector.shape_cast %162 : vector<1x5x32xf32> to vector<5x32xf32>
    %164 = vector.shape_cast %161 : vector<5x32xf32> to vector<1x5x32xf32>
    tpu.vector_store %arg14[%c0_63, %c0_64, %c0_65], %164 {strides = array<i32>} : memref<1x5x32xf32, #tpu.memory_space<vmem>>, vector<1x5x32xf32>,
    return
  }
  func.func @transform_0(%arg0: i32) -> (i32, i32, i32) {
    %c0_i32 = arith.constant 0 : i32
    %c0_i32_0 = arith.constant 0 : i32
    %c0_i32_1 = arith.constant 0 : i32
    return %arg0, %c0_i32, %c0_i32_0 : i32, i32, i32
  }
  func.func @transform_1(%arg0: i32) -> (i32, i32) {
    %c0_i32 = arith.constant 0 : i32
    %c0_i32_0 = arith.constant 0 : i32
    %c0_i32_1 = arith.constant 0 : i32
    return %c0_i32, %c0_i32_0 : i32, i32
  }
  func.func @transform_2(%arg0: i32) -> (i32, i32) {
    %c0_i32 = arith.constant 0 : i32
    %c0_i32_0 = arith.constant 0 : i32
    %c0_i32_1 = arith.constant 0 : i32
    return %c0_i32, %c0_i32_0 : i32, i32
  }
  func.func @transform_3(%arg0: i32) -> (i32, i32) {
    %c0_i32 = arith.constant 0 : i32
    %c0_i32_0 = arith.constant 0 : i32
    %c0_i32_1 = arith.constant 0 : i32
    return %c0_i32, %c0_i32_0 : i32, i32
  }
  func.func @transform_4(%arg0: i32) -> (i32, i32) {
    %c0_i32 = arith.constant 0 : i32
    %c0_i32_0 = arith.constant 0 : i32
    %c0_i32_1 = arith.constant 0 : i32
    return %c0_i32, %c0_i32_0 : i32, i32
  }
  func.func @transform_5(%arg0: i32) -> (i32, i32) {
    %c0_i32 = arith.constant 0 : i32
    %c0_i32_0 = arith.constant 0 : i32
    %c0_i32_1 = arith.constant 0 : i32
    return %c0_i32, %c0_i32_0 : i32, i32
  }
  func.func @transform_6(%arg0: i32) -> (i32, i32) {
    %c0_i32 = arith.constant 0 : i32
    %c0_i32_0 = arith.constant 0 : i32
    %c0_i32_1 = arith.constant 0 : i32
    return %c0_i32, %c0_i32_0 : i32, i32
  }
  func.func @transform_7(%arg0: i32) -> (i32, i32) {
    %c0_i32 = arith.constant 0 : i32
    %c0_i32_0 = arith.constant 0 : i32
    %c0_i32_1 = arith.constant 0 : i32
    return %c0_i32, %c0_i32_0 : i32, i32
  }
  func.func @transform_8(%arg0: i32) -> (i32, i32) {
    %c0_i32 = arith.constant 0 : i32
    %c0_i32_0 = arith.constant 0 : i32
    %c0_i32_1 = arith.constant 0 : i32
    return %c0_i32, %c0_i32_0 : i32, i32
  }
  func.func @transform_9(%arg0: i32) -> (i32, i32) {
    %c0_i32 = arith.constant 0 : i32
    %c0_i32_0 = arith.constant 0 : i32
    %c0_i32_1 = arith.constant 0 : i32
    return %c0_i32, %c0_i32_0 : i32, i32
  }
  func.func @transform_10(%arg0: i32) -> (i32, i32) {
    %c0_i32 = arith.constant 0 : i32
    %c0_i32_0 = arith.constant 0 : i32
    %c0_i32_1 = arith.constant 0 : i32
    return %c0_i32, %c0_i32_0 : i32, i32
  }
  func.func @transform_11(%arg0: i32) -> (i32, i32) {
    %c0_i32 = arith.constant 0 : i32
    %c0_i32_0 = arith.constant 0 : i32
    %c0_i32_1 = arith.constant 0 : i32
    return %c0_i32, %c0_i32_0 : i32, i32
  }
  func.func @transform_12(%arg0: i32) -> (i32, i32) {
    %c0_i32 = arith.constant 0 : i32
    %c0_i32_0 = arith.constant 0 : i32
    %c0_i32_1 = arith.constant 0 : i32
    return %c0_i32, %c0_i32_0 : i32, i32
  }
  func.func @transform_13(%arg0: i32) -> (i32, i32, i32) {
    %c0_i32 = arith.constant 0 : i32
    %c0_i32_0 = arith.constant 0 : i32
    %c0_i32_1 = arith.constant 0 : i32
    return %arg0, %c0_i32, %c0_i32_0 : i32, i32, i32
  }
}

</mosaic_0001>

<bundles_post_ra>
// kernel: build_transformer_forward.7
= control target key start
LH: loop header
LB: loop body
LE: loop exit
PB: predicated region body
PF: predicated region fallthrough
CT: control target
= control target key end

     0   :  { %13 = vsyncpa [#allocation3], 0  ;;  %vm31_vm0 = vcmask 254976   ;;  %s351_s0 = inlined_call_operand.vmem [shape: f32[2,32], index: 0, kind: input, shape index: {}]   ;;  %s352_s1 = inlined_call_operand.vmem [shape: f32[1,32], index: 1, kind: input, shape index: {}]   ;;  %s353_s2 = inlined_call_operand.vmem [shape: f32[1,32], index: 2, kind: input, shape index: {}]   ;;  %s354_s3 = inlined_call_operand.vmem [shape: f32[1,32], index: 3, kind: input, shape index: {}]   ;;  %s355_s4 = inlined_call_operand.vmem [shape: f32[1,32], index: 4, kind: input, shape index: {}]   ;;  %s356_s5 = inlined_call_operand.vmem [shape: f32[32,128], index: 5, kind: input, shape index: {}]   ;;  %s357_s6 = inlined_call_operand.hbm [shape: f32[2,32], index: 6, kind: output, shape index: {0}]   ;;  %s358_s7 = inlined_call_operand.hbm [shape: f32[2,128], index: 7, kind: output, shape index: {1}]  }
   0x1   :  { %v28_v0 = vld [vmem:[%s351_s0] sm:$0x3] }
   0x2   :  { %14 = vsyncpa [#allocation5], 0  ;;  %v32_v1 = vsel %vm31_vm0, %v28_v0, 0.0  ;;  %v99_v7 = vld [vmem:[%s356_s5] sm:$0xff]  ;;  %v100_v8 = vld [vmem:[%s356_s5 + $0x8] sm:$0xff]  ;;  %v251_v10 = vmov 0.0  }
   0x3   :  { %33 = vadd.xlane.f32.xlu0 %v32_v1  ;;  %v101_v9 = vld [vmem:[%s356_s5 + $0x10] sm:$0xff]  ;;  %187 = vmatprep.subr.bf16.mxu0 %v251_v10  ;;  %v104_v11 = vpack.c.bf16 %v100_v8, %v99_v7  ;;  %v102_v12 = vld [vmem:[%s356_s5 + $0x18] sm:$0xff]  ;;  %vm252_vm1 = vmmov 0   ;;  %v179_v18 = vld [vmem:[%s352_s1] ss:$0 sm:$0xff]  ;;  %vm106_vm2 = vcmask 261120  }
   0x4   :  { %191 = vmatprep.mubr.msk.bf16.mxu0 %vm252_vm1, %v251_v10  ;;  %v105_v13 = vpack.c.bf16 %v102_v12, %v101_v9  ;;  %v180_v20 = vld [vmem:[%s353_s2] ss:$0 sm:$0xff]  ;;  %s253_s15 = smov [#allocation2]  }
   0x5   :  { %188 = vmatpush3.bf16.msra.mxu0 %v104_v11  ;;  %v181_v43 = vld [vmem:[%s354_s3] ss:$0 sm:$0xff]  ;;  %s157_s16 = sshll.u32 %s253_s15, 4  ;;  %s158_s16 = int_to_ptr.vmem [resolvable:$true] %s157_s16 }
   0x6   :  { %189 = vmatprep.subr.bf16.mxu0 %v251_v10  ;;  %v182_v45 = vld [vmem:[%s355_s4] ss:$0 sm:$0xff]  ;;  %s203_s17 = scalar_lea.vmem %s158_s16, 32  ;;  %p208_p1 = scmp.lt.s32.totalorder %s158_s16, %s158_s16 }
   0x7   :  { %p204_p0 = scmp.ne.s32.totalorder %s158_s16, %s203_s17  ;;  %p209_p2 = scmp.lt.s32.totalorder %s203_s17, %s203_s17 }
   0x9   :  { %190 = vmatpush3.bf16.msra.mxu0 %v105_v13  ;;  %p210_p3 = por %p209_p2, %p208_p1 }
   0xb   :  { %p211_p4 = pnand %p210_p3, %p204_p0 }
  0x90   :  { %v34_v2 = vpop.xlane.xlu0 %33 }
  0x91   :  { %v36_v3 = vmul.f32 0.03125, %v34_v2 }
  0x93   :  { %v37_v4 = vsub.f32 %v28_v0, %v36_v3 }
  0x95   :  { %v38_v5 = vmul.f32 %v37_v4, %v37_v4 }
  0x97   :  { %v39_v6 = vsel %vm31_vm0, %v38_v5, 0.0 }
  0x98   :  { %40 = vadd.xlane.f32.xlu0 %v39_v6 }
 0x125   :  { %v41_v14 = vpop.xlane.xlu0 %40 }
 0x126   :  { %v42_v15 = vmul.f32 0.03125, %v41_v14 }
 0x128   :  { %v43_v16 = vadd.f32 1e-06, %v42_v15 }
 0x12a   :  { %199 = vrsqrt.f32 %v43_v16 }
 0x134   :  { %v200_v17 = vpop.eup %199 }
 0x135   :  { %v45_v19 = vmul.f32 %v200_v17, %v37_v4 }
 0x137   :  { %v52_v21 = vmul.f32 %v179_v18, %v45_v19 }
 0x139   :  { %v59_v22 = vadd.f32 %v180_v20, %v52_v21 }
 0x13b   :  { %v61_v23 = vsel %vm31_vm0, %v59_v22, 0.0  ;;  %60 = vst.msk [vmem:[#allocation2] sm:$0x3] %vm31_vm0, %v59_v22 }
 0x13c   :  { %v62_v24 = vrot.slane %v61_v23, 4 }
 0x13e   :  { %v63_v25 = vadd.f32 %v62_v24, %v61_v23 }
 0x140   :  { %v64_v26 = vrot.slane %v63_v25, 2 }
 0x142   :  { %v65_v27 = vadd.f32 %v64_v26, %v63_v25 }
 0x144   :  { %v66_v28 = vrot.slane %v65_v27, 1 }
 0x146   :  { %v67_v29 = vadd.f32 %v66_v28, %v65_v27 }
 0x148   :  { %v69_v30 = vmul.f32 0.5, %v67_v29 }
 0x14a   :  { %v70_v31 = vsub.f32 %v59_v22, %v69_v30 }
 0x14c   :  { %v71_v32 = vmul.f32 %v70_v31, %v70_v31 }
 0x14e   :  { %v72_v33 = vsel %vm31_vm0, %v71_v32, 0.0 }
 0x14f   :  { %v73_v34 = vrot.slane %v72_v33, 4 }
 0x151   :  { %v74_v35 = vadd.f32 %v73_v34, %v72_v33 }
 0x153   :  { %v75_v36 = vrot.slane %v74_v35, 2 }
 0x155   :  { %v76_v37 = vadd.f32 %v75_v36, %v74_v35 }
 0x157   :  { %v77_v38 = vrot.slane %v76_v37, 1 }
 0x159   :  { %v78_v39 = vadd.f32 %v77_v38, %v76_v37 }
 0x15b   :  { %v79_v40 = vmul.f32 0.5, %v78_v39 }
 0x15d   :  { %v80_v41 = vadd.f32 1e-05, %v79_v40 }
 0x15f   :  { %201 = vrsqrt.f32 %v80_v41 }
 0x169   :  { %v202_v42 = vpop.eup %201 }
 0x16a   :  { %v82_v44 = vmul.f32 %v202_v42, %v70_v31 }
 0x16c   :  { %v90_v46 = vmul.f32 %v181_v43, %v82_v44 }
 0x16e   :  { %v98_v47 = vadd.f32 %v182_v45, %v90_v46 }
 0x170   :  { %v103_v48 = vpack.c.bf16 %v98_v47, %v98_v47 }
 0x172   :  { %192 = vmatmul.mubr.msk.bf16.vlgmr.msra.gmra.mrb[0].mxu0 %vm106_vm2, %v103_v48 }
 0x173   :  { %214 = shalt.err (!%p211_p4)
}
 0x174   :  { %s215_s19 = scalar_lea.hbm %s357_s6, 32 }
 0x175   :  { %p216_p5 = scmp.ne.s32.totalorder %s357_s6, %s215_s19  ;;  %p219_p6 = scmp.lt.u32.totalorder %s215_s19, %s357_s6 }
 0x177   :  { %p221_p7 = pnand %p219_p6, %p216_p5 }
 0x179   :  { %224 = shalt.err (!%p221_p7)
}
 0x17a   :  { %160 = dma.vmem_to_hbm [thread:$0]  %s158_s16, 32, %s357_s6, [#allocation3]  }
 0x17b   :  { %s254_s25 = smov [#allocation4]  }
 0x17c   :  { %s167_s26 = sshll.u32 %s254_s25, 4  ;;  %s168_s26 = int_to_ptr.vmem [resolvable:$true] %s167_s26 }
 0x17d   :  { %s225_s27 = scalar_lea.vmem %s168_s26, 32  ;;  %p230_p9 = scmp.lt.s32.totalorder %s168_s26, %s168_s26 }
 0x17e   :  { %p226_p8 = scmp.ne.s32.totalorder %s168_s26, %s225_s27  ;;  %p231_p10 = scmp.lt.s32.totalorder %s225_s27, %s225_s27 }
 0x180   :  { %p232_p11 = por %p231_p10, %p230_p9 }
 0x182   :  { %p233_p12 = pnand %p232_p11, %p226_p8 }
 0x245   :  { %v144_v49 = vpop.f32.mrb[0].mxu0 }
 0x246   :  { %150 = vst [vmem:[#allocation4] sm:$0x3] %v144_v49  ;;  %v193_v50 = vpop.f32.mrb[1].mxu0 }
 0x247   :  { %v147_v51 = vpop.f32.mrb[2].mxu0 }
 0x248   :  { %236 = shalt.err (!%p233_p12)
}
 0x249   :  { %s237_s0 = scalar_lea.hbm %s358_s7, 32 }
 0x24a   :  { %p238_p13 = scmp.ne.s32.totalorder %s358_s7, %s237_s0  ;;  %p241_p0 = scmp.lt.u32.totalorder %s237_s0, %s358_s7 }
 0x24c   :  { %p243_p1 = pnand %p241_p0, %p238_p13 }
 0x24e   :  { %246 = shalt.err (!%p243_p1)
}
 0x24f   :  { %170 = dma.vmem_to_hbm [thread:$0]  %s168_s26, 32, %s358_s7, [#allocation5]   ;;  %v194_v52 = vpop.f32.mrb[3].mxu0 }
 0x250   :  { %247 = dma.done.wait [#allocation3], 32  }
 0x251   :  { %248 = vsyncadd [#allocation3], 4294967264 }
 0x252   :  { %249 = dma.done.wait [#allocation5], 32  }
 0x253   :  { %250 = vsyncadd [#allocation5], 4294967264 }
 0x254   :  { %177 = vsyncpa [#allocation3], 1 }
 0x255   :  { %178 = vsyncpa [#allocation5], 1 }

// kernel: build_transformer_forward.4
= control target key start
LH: loop header
LB: loop body
LE: loop exit
PB: predicated region body
PF: predicated region fallthrough
CT: control target
= control target key end

     0   :  { %s508_s21 = smov 0   ;;  %s629_s0 = inlined_call_operand.vmem [shape: f32[2,4,192], index: 0, kind: input, shape index: {}]   ;;  %s630_s1 = inlined_call_operand.vmem [shape: f32[192,32], index: 1, kind: input, shape index: {}]   ;;  %s631_s2 = inlined_call_operand.vmem [shape: f32[1,32], index: 2, kind: input, shape index: {}]   ;;  %s632_s3 = inlined_call_operand.vmem [shape: f32[1,32], index: 3, kind: input, shape index: {}]   ;;  %s633_s4 = inlined_call_operand.vmem [shape: f32[5,32], index: 4, kind: input, shape index: {}]   ;;  %s634_s5 = inlined_call_operand.vmem [shape: f32[2,1,32], index: 5, kind: input, shape index: {}]   ;;  %s635_s6 = inlined_call_operand.vmem [shape: f32[2,5,32], index: 6, kind: output, shape index: {}]  }
   0x1 LB: > { %s441_s22 = sadd.s32 4294967295, %s470_s21   ;;  %p445_p0 = scmp.ge.s32.totalorder %s470_s21, 1  ;;  %s470_s21 = sphi %s508_s21, %s16_s21  }
   0x2   : > { %p220_p1 = scmp.lt.s32.totalorder %s470_s21, 3 }
   0x4   : > { %p221_p2 = pnand %p445_p0, %p220_p1 }
   0x5   : > { %v266_v0 = vld [vmem:[%s630_s1] sm:$0xff] (!%p221_p2)  ;;  %v267_v1 = vld [vmem:[%s630_s1 + $0x8] sm:$0xff] (!%p221_p2)  ;;  %v268_v2 = vld [vmem:[%s630_s1 + $0x10] sm:$0xff] (!%p221_p2)  ;;  %p252_p3 = scmp.lt.s32.totalorder (!%p221_p2), %s441_s22, 1  ;;  %v472_v3 = vmov (!%p221_p2), 0   ;;  %vm314_vm0 = vcmask (!%p221_p2), 523264   ;;  %v371_v47 = vlaneseq (!%p221_p2) }
   0x6   : > { %224 = sbr.rel (%p221_p2) target bundleno = 274 (0x112), region = 44  ;;  %318 = vmatprep.subr.bf16.mxu0 (!%p221_p2), %v472_v3  ;;  %v295_v4 = vpack.c.bf16 (!%p221_p2), %v267_v1, %v266_v0  ;;  %v269_v5 = vld [vmem:[%s630_s1 + $0x18] sm:$0xff] (!%p221_p2)  ;;  %v270_v7 = vld [vmem:[%s630_s1 + $0x20] sm:$0xff] (!%p221_p2)  ;;  %v271_v8 = vld [vmem:[%s630_s1 + $0x28] sm:$0xff] (!%p221_p2)  ;;  %vm364_vm1 = vcmask (!%p221_p2), 253952   ;;  %vm377_vm2 = vcmask (!%p221_p2), 257024  }
   0x7   : > { %v296_v6 = vpack.c.bf16 (!%p221_p2), %v269_v5, %v268_v2  ;;  %v297_v9 = vpack.c.bf16 (!%p221_p2), %v271_v8, %v270_v7  ;;  %v272_v10 = vld [vmem:[%s630_s1 + $0x30] sm:$0xff] (!%p221_p2)  ;;  %v273_v11 = vld [vmem:[%s630_s1 + $0x38] sm:$0xff] (!%p221_p2)  ;;  %v274_v16 = vld [vmem:[%s630_s1 + $0x40] sm:$0xff] (!%p221_p2)  ;;  %v372_v48 = vshrl.u32 (!%p221_p2), %v371_v47, 7 }
   0x8   : > { %319 = vmatpush1.bf16.msra.mxu0 (!%p221_p2), %v295_v4  ;;  %v298_v14 = vpack.c.bf16 (!%p221_p2), %v273_v11, %v272_v10  ;;  %v275_v17 = vld [vmem:[%s630_s1 + $0x48] sm:$0xff] (!%p221_p2)  ;;  %v276_v19 = vld [vmem:[%s630_s1 + $0x50] sm:$0xff] (!%p221_p2)  ;;  %v277_v20 = vld [vmem:[%s630_s1 + $0x58] sm:$0xff] (!%p221_p2) }
   0x9   : > { %320 = vmatprep.subr.bf16.mxu0 (!%p221_p2), %v472_v3  ;;  %v299_v18 = vpack.c.bf16 (!%p221_p2), %v275_v17, %v274_v16  ;;  %v300_v21 = vpack.c.bf16 (!%p221_p2), %v277_v20, %v276_v19  ;;  %v278_v22 = vld [vmem:[%s630_s1 + $0x60] sm:$0xff] (!%p221_p2)  ;;  %v279_v23 = vld [vmem:[%s630_s1 + $0x68] sm:$0xff] (!%p221_p2)  ;;  %v280_v25 = vld [vmem:[%s630_s1 + $0x70] sm:$0xff] (!%p221_p2)  ;;  %v373_v49 = vsub.s32 (!%p221_p2), 0, %v372_v48 }
   0xa   : > { %v301_v24 = vpack.c.bf16 (!%p221_p2), %v279_v23, %v278_v22  ;;  %v281_v26 = vld [vmem:[%s630_s1 + $0x78] sm:$0xff] (!%p221_p2)  ;;  %v282_v28 = vld [vmem:[%s630_s1 + $0x80] sm:$0xff] (!%p221_p2)  ;;  %v283_v29 = vld [vmem:[%s630_s1 + $0x88] sm:$0xff] (!%p221_p2) }
   0xb   : > { %v302_v27 = vpack.c.bf16 (!%p221_p2), %v281_v26, %v280_v25  ;;  %v303_v30 = vpack.c.bf16 (!%p221_p2), %v283_v29, %v282_v28  ;;  %v284_v31 = vld [vmem:[%s630_s1 + $0x90] sm:$0xff] (!%p221_p2)  ;;  %v285_v32 = vld [vmem:[%s630_s1 + $0x98] sm:$0xff] (!%p221_p2)  ;;  %v286_v34 = vld [vmem:[%s630_s1 + $0xa0] sm:$0xff] (!%p221_p2) }
   0xc   : > { %321 = vmatpush1.bf16.msra.mxu0 (!%p221_p2), %v296_v6  ;;  %v304_v33 = vpack.c.bf16 (!%p221_p2), %v285_v32, %v284_v31  ;;  %v287_v35 = vld [vmem:[%s630_s1 + $0xa8] sm:$0xff] (!%p221_p2)  ;;  %v288_v37 = vld [vmem:[%s630_s1 + $0xb0] sm:$0xff] (!%p221_p2)  ;;  %v289_v38 = vld [vmem:[%s630_s1 + $0xb8] sm:$0xff] (!%p221_p2) }
   0xd   : > { %s637_s22 = smov (!%p252_p3, %s441_s22), 1  ;;  %322 = vmatprep.subr.bf16.mxu0 %v472_v3  ;;  %v305_v36 = vpack.c.bf16 %v287_v35, %v286_v34  ;;  %v306_v39 = vpack.c.bf16 %v289_v38, %v288_v37  ;;  %v358_v42 = vld [vmem:[%s633_s4] sm:$0x1f] }
   0xe   : > { %s453_s11 = sshll.u32 %s637_s22, 3  ;;  %s259_s10 = scalar_lea.vmem %s634_s5, %s637_s22  ;;  %v361_v43 = vld [vmem:[%s632_s3] sm:$0x1]  ;;  %v367_v51 = vrot.slane %v358_v42, 1 }
   0xf   : > { %s256_s14 = scalar_lea.vmem %s629_s0, %s453_s11  ;;  %v359_v41 = vld [vmem:[%s259_s10] sm:$0x1]  ;;  %v362_v45 = vadd.f32 %v361_v43, %v358_v42  ;;  %s263_s18 = scalar_lea.vmem %s635_s6, %s453_s11 }
  0x10   : > { %v265_v12 = vld [vmem:[%s256_s14] sm:$0xff]  ;;  %323 = vmatpush1.bf16.msra.mxu0 %v297_v9  ;;  %v360_v44 = vmul.f32 3.0, %v359_v41 }
  0x11   : > { %v291_v13 = vcombine.high %v265_v12, %v265_v12  ;;  %324 = vmatprep.subr.bf16.mxu0 %v472_v3  ;;  %v293_v40 = vpack.c.bf16 %v265_v12, %v265_v12  ;;  %v449_v50 = vld [vmem:[%s631_s2] ss:$0 sm:$0xff] }
  0x12   : > { %v363_v46 = vadd.f32 %v362_v45, %v360_v44  ;;  %v374_v54 = vrot.slane %v360_v44, %v373_v49 }
  0x13   : > { %v294_v15 = vpack.c.bf16 %v291_v13, %v291_v13 }
  0x14   : > { %325 = vmatpush1.bf16.msra.mxu0 %v298_v14  ;;  %365 = vst.msk [vmem:[%s263_s18] sm:$0x1] %vm364_vm1, %v363_v46 }
  0x15   : > { %450 = vmatprep.mubr.msk.bf16.mxu0 %vm314_vm0, %v294_v15  ;;  %326 = vmatprep.subr.bf16.mxu0 %v472_v3 }
  0x18   : > { %327 = vmatpush1.bf16.msra.mxu0 %v299_v18 }
  0x19   : > { %328 = vmatprep.subr.bf16.mxu0 %v472_v3 }
  0x1c   : > { %329 = vmatpush1.bf16.msra.mxu0 %v300_v21 }
  0x1d   : > { %330 = vmatprep.subr.bf16.mxu0 %v472_v3 }
  0x20   : > { %331 = vmatpush1.bf16.msra.mxu0 %v301_v24 }
  0x21   : > { %332 = vmatprep.subr.bf16.mxu0 %v472_v3 }
  0x24   : > { %333 = vmatpush1.bf16.msra.mxu0 %v302_v27 }
  0x25   : > { %334 = vmatprep.subr.bf16.mxu0 %v472_v3 }
  0x28   : > { %335 = vmatpush1.bf16.msra.mxu0 %v303_v30 }
  0x29   : > { %336 = vmatprep.subr.bf16.mxu0 %v472_v3 }
  0x2c   : > { %337 = vmatpush1.bf16.msra.mxu0 %v304_v33 }
  0x2d   : > { %338 = vmatprep.subr.bf16.mxu0 %v472_v3 }
  0x30   : > { %339 = vmatpush1.bf16.msra.mxu0 %v305_v36 }
  0x31   : > { %340 = vmatprep.subr.bf16.mxu0 %v472_v3 }
  0x34   : > { %341 = vmatpush1.bf16.msra.mxu0 %v306_v39 }
  0x37   : > { %351 = vmatmul.mubr.bf16.vlgmr.msra.gmra.mrb[0].mxu0 %v293_v40 }
 0x10a   : > { %v352_v52 = vpop.f32.mrb[0].mxu0 }
 0x10b   : > { %v353_v53 = vadd.f32 %v449_v50, %v352_v52  ;;  %v354_v55 = vpop.f32.mrb[1].mxu0 }
 0x10c   : > { %v355_v56 = vpop.f32.mrb[2].mxu0 }
 0x10d   : > { %v369_v57 = vadd.f32 %v367_v51, %v353_v53  ;;  %v356_v58 = vpop.f32.mrb[3].mxu0 }
 0x10f   : > { %v376_v59 = vadd.f32 %v374_v54, %v369_v57 }
 0x111   : > { %378 = vst.msk [vmem:[%s263_s18 + $0x1] sm:$0xf] %vm377_vm2, %v376_v59 }
 0x112 PF: > { %s16_s21 = sadd.s32 1, %s470_s21  }
 0x113   : > { %p13_p4 = scmp.ge.s32.totalorder %s16_s21, 4  }
 0x115   :  { %15 = sbr.rel (!%p13_p4) target bundleno = 1 (0x1), region = 77 }

// kernel: build_transformer_forward.5
= control target key start
LH: loop header
LB: loop body
LE: loop exit
PB: predicated region body
PF: predicated region fallthrough
CT: control target
= control target key end

     0   :  { %s1791_s25 = smov 0   ;;  %s2029_s0 = inlined_call_operand.vmem [shape: f32[2,5,32], index: 0, kind: input, shape index: {}]   ;;  %s2030_s1 = inlined_call_operand.vmem [shape: f32[1,32], index: 1, kind: input, shape index: {}]   ;;  %s2031_s2 = inlined_call_operand.vmem [shape: f32[1,32], index: 2, kind: input, shape index: {}]   ;;  %s2032_s3 = inlined_call_operand.vmem [shape: f32[32,96], index: 3, kind: input, shape index: {}]   ;;  %s2033_s4 = inlined_call_operand.vmem [shape: f32[1,96], index: 4, kind: input, shape index: {}]   ;;  %s2034_s5 = inlined_call_operand.vmem [shape: f32[32,32], index: 5, kind: input, shape index: {}]   ;;  %s2035_s6 = inlined_call_operand.vmem [shape: f32[1,32], index: 6, kind: input, shape index: {}]   ;;  %s2036_s7 = inlined_call_operand.vmem [shape: f32[1,32], index: 7, kind: input, shape index: {}]   ;;  %s2037_s8 = inlined_call_operand.vmem [shape: f32[1,32], index: 8, kind: input, shape index: {}]   ;;  %s2038_s9 = inlined_call_operand.vmem [shape: f32[32,128], index: 9, kind: input, shape index: {}]   ;;  %s2039_s10 = inlined_call_operand.vmem [shape: f32[1,128], index: 10, kind: input, shape index: {}]   ;;  %s2040_s11 = inlined_call_operand.vmem [shape: f32[128,32], index: 11, kind: input, shape index: {}]   ;;  %s2041_s12 = inlined_call_operand.vmem [shape: f32[1,32], index: 12, kind: input, shape index: {}]   ;;  %s2042_s13 = inlined_call_operand.vmem [shape: f32[2,5,32], index: 13, kind: output, shape index: {}]  }
   0x1 LB: > { %s1497_s26 = sadd.s32 4294967295, %s1703_s25   ;;  %p1501_p0 = scmp.ge.s32.totalorder %s1703_s25, 1  ;;  %s1703_s25 = sphi %s1791_s25, %s23_s25  }
   0x2   : > { %p386_p1 = scmp.lt.s32.totalorder %s1703_s25, 3 }
   0x4   : > { %p387_p2 = pnand %p1501_p0, %p386_p1 }
   0x5   : > { %p428_p3 = scmp.lt.s32.totalorder (!%p387_p2), %s1497_s26, 1  ;;  %vm440_vm0 = vcmask (!%p387_p2), 258048   ;;  %v469_v7 = vld [vmem:[%s2032_s3] sm:$0xff] (!%p387_p2)  ;;  %v470_v8 = vld [vmem:[%s2032_s3 + $0x8] sm:$0xff] (!%p387_p2)  ;;  %v471_v9 = vld [vmem:[%s2032_s3 + $0x10] sm:$0xff] (!%p387_p2)  ;;  %v1705_v10 = vmov (!%p387_p2), 0.0  }
   0x6   : > { %390 = sbr.rel (%p387_p2) target bundleno = 3053 (0xbed), region = 72  ;;  %1567 = vmatprep.subr.bf16.mxu0 (!%p387_p2), %v1705_v10  ;;  %v474_v11 = vpack.c.bf16 (!%p387_p2), %v470_v8, %v469_v7  ;;  %v472_v12 = vld [vmem:[%s2032_s3 + $0x18] sm:$0xff] (!%p387_p2)  ;;  %vm1706_vm1 = vmmov (!%p387_p2), 0   ;;  %1580 = vmatprep.subr.mxu1 (!%p387_p2), %v1705_v10  ;;  %v1504_v18 = vld [vmem:[%s2030_s1] ss:$0 sm:$0xff] (!%p387_p2)  ;;  %vm483_vm2 = vcmask (!%p387_p2), 261120  }
   0x7   : > { %1571 = vmatprep.mubr.msk.bf16.mxu0 (!%p387_p2), %vm1706_vm1, %v1705_v10  ;;  %1582 = vmatprep.mubr.msk.f32.mxu1 (!%p387_p2), %vm1706_vm1, %v1705_v10  ;;  %v475_v13 = vpack.c.bf16 (!%p387_p2), %v472_v12, %v471_v9  ;;  %v1505_v20 = vld [vmem:[%s2031_s2] ss:$0 sm:$0xff] (!%p387_p2)  ;;  %s1707_s14 = smov (!%p387_p2), 64   ;;  %s1708_s15 = smov (!%p387_p2), 96   ;;  %vm530_vm3 = vcmask (!%p387_p2), 64512   ;;  %vm624_vm4 = vcmask (!%p387_p2), 1044480  }
   0x8   : > { %1568 = vmatpush3.bf16.msra.mxu0 (!%p387_p2), %v474_v11  ;;  %v1506_v24 = vld [vmem:[%s2033_s4] ss:$0 sm:$0xff] (!%p387_p2)  ;;  %s1709_s16 = smov (!%p387_p2), 88   ;;  %s1710_s17 = smov (!%p387_p2), 120   ;;  %vm606_vm5 = vcmask (!%p387_p2), 36864   ;;  %vm620_vm6 = vcmask (!%p387_p2), 39936  }
   0x9   : > { %1569 = vmatprep.subr.bf16.mxu0 (!%p387_p2), %v1705_v10  ;;  %s1711_s18 = smov (!%p387_p2), 80   ;;  %s1712_s19 = smov (!%p387_p2), 112   ;;  %vm1211_vm7 = vcmask (!%p387_p2), 130048   ;;  %vm1213_vm8 = vcmask (!%p387_p2), 195584  }
   0xa   : > { %s1713_s20 = smov (!%p387_p2), 72   ;;  %s1714_s21 = smov (!%p387_p2), 104  }
   0xb   : > { %s1715_s22 = smov (!%p387_p2), 48   ;;  %s1716_s23 = smov (!%p387_p2), 40  }
   0xc   : > { %1570 = vmatpush3.bf16.msra.mxu0 (!%p387_p2), %v475_v13  ;;  %s1717_s24 = smov (!%p387_p2), 56  }
   0xd   : > { %s2044_s26 = smov (!%p428_p3, %s1497_s26), 1  ;;  %1575 = vmatprep.subr.mxu0 %v1705_v10 }
   0xe   : > { %s1502_s27 = sshll.u32 %s2044_s26, 3 }
   0xf   : > { %s431_s30 = scalar_lea.vmem %s2029_s0, %s1502_s27 }
  0x10   : > { %v1807_v0 = vld [vmem:[%s431_s30] sm:$0x1f] }
  0x11   : > { %v441_v1 = vsel %vm440_vm0, %v1807_v0, 0.0 }
  0x12   : > { %442 = vadd.xlane.f32.xlu0 %v441_v1 }
  0x9f   : > { %v443_v2 = vpop.xlane.xlu0 %442 }
  0xa0   : > { %v445_v3 = vmul.f32 0.03125, %v443_v2 }
  0xa2   : > { %v446_v4 = vsub.f32 %v1807_v0, %v445_v3 }
  0xa4   : > { %v447_v5 = vmul.f32 %v446_v4, %v446_v4 }
  0xa6   : > { %v448_v6 = vsel %vm440_vm0, %v447_v5, 0.0 }
  0xa7   : > { %449 = vadd.xlane.f32.xlu0 %v448_v6 }
 0x134   : > { %v450_v14 = vpop.xlane.xlu0 %449 }
 0x135   : > { %v451_v15 = vmul.f32 0.03125, %v450_v14 }
 0x137   : > { %v452_v16 = vadd.f32 1e-06, %v451_v15 }
 0x139   : > { %1675 = vrsqrt.f32 %v452_v16 }
 0x143   : > { %v1676_v17 = vpop.eup %1675 }
 0x144   : > { %v454_v19 = vmul.f32 %v1676_v17, %v446_v4 }
 0x146   : > { %v461_v21 = vmul.f32 %v1504_v18, %v454_v19 }
 0x148   : > { %v468_v22 = vadd.f32 %v1505_v20, %v461_v21 }
 0x14a   : > { %v473_v23 = vpack.c.bf16 %v468_v22, %v468_v22 }
 0x14c   : > { %1572 = vmatmul.mubr.msk.bf16.vlgmr.msra.gmra.mrb[0].mxu0 %vm483_vm2, %v473_v23 }
 0x14d   : > { %1577 = vmatprep.mubr.msk.f32.mxu0 %vm1706_vm1, %v1705_v10 }
 0x21f   : > { %v521_v25 = vpop.f32.mrb[0].mxu0 }
 0x220   : > { %v1845_v26 = vadd.f32 %v1506_v24, %v521_v25  ;;  %v1573_v27 = vpop.f32.mrb[1].mxu0 }
 0x221   : > { %v524_v28 = vpop.f32.mrb[2].mxu0 }
 0x222   : > { %618 = vrot.lane.b32.xlu0 %v1845_v26, %s1707_s14  ;;  %528 = vrot.lane.b32.xlu1 %v1845_v26, %s1708_s15  ;;  %v1574_v29 = vpop.f32.mrb[3].mxu0 }
 0x223   : > { %v1215_v29 = vld [vmem:[%s2034_s5] sm:$0xff] }
 0x226   : > { %699 = vrot.lane.b32.xlu0 %v1845_v26, %s1709_s16 }
 0x22a   : > { %697 = vrot.lane.b32.xlu0 %v1845_v26, %s1710_s17 }
 0x294   : > { %v619_v30 = vpop.permute.xlu0 %618  ;;  %v529_v31 = vpop.permute.xlu1 %528 }
 0x295   : > { %1576 = vmatpush3.xpose.msk.msra.mxu0 %vm530_vm3, %v529_v31  ;;  %1581 = vmatpush3.msk.msra.mxu1 %vm624_vm4, %v619_v30  ;;  %v1216_v30 = vld [vmem:[%s2034_s5 + $0x8] sm:$0xff] }
 0x296   : > { %1585 = vmatprep.subr.mxu1 %v1705_v10  ;;  %1590 = vmatprep.subr.mxu0 %v1705_v10  ;;  %v1220_v31 = vpack.c.bf16 %v1216_v30, %v1215_v29  ;;  %v1379_v29 = vld [vmem:[%s2040_s11 + $0x50] sm:$0xff]  ;;  %v1380_v30 = vld [vmem:[%s2040_s11 + $0x58] sm:$0xff] }
 0x298   : > { %1578 = vmatmul.mubr.msk.f32.vlgmr.msra.gmra.mrb[4].mxu0 %vm530_vm3, %v1845_v26  ;;  %v700_v41 = vpop.permute.xlu0 %699 }
 0x299   : > { %1592 = vmatprep.mubr.msk.f32.mxu0 %vm1706_vm1, %v1705_v10 }
 0x29c   : > { %v698_v42 = vpop.permute.xlu0 %697 }
 0x36b   : > { %v601_v32 = vpop.f32.mrb[4].mxu0 }
 0x36c   : > { %v605_v33 = vmul.f32 0.35355338, %v601_v32  ;;  %v1579_v34 = vpop.f32.mrb[5].mxu0  ;;  %v1217_v32 = vld [vmem:[%s2034_s5 + $0x10] sm:$0xff] }
 0x36e   : > { %v607_v35 = vsel %vm606_vm5, %v605_v33, -inf }
 0x36f   : > { %608 = vmax.xlane.f32.xlu1 %v607_v35 }
 0x380   : > { %866 = vrot.lane.b32.xlu1 %v1845_v26, %s1711_s18  ;;  %s435_s18 = scalar_lea.vmem %s2042_s13, %s1502_s27 }
 0x3fc   : > { %v609_v36 = vpop.xlane.xlu1 %608 }
 0x3fd   : > { %v610_v37 = vsub.f32 %v605_v33, %v609_v36  ;;  %v1218_v33 = vld [vmem:[%s2034_s5 + $0x18] sm:$0xff] }
 0x3fe   : > { %v1221_v34 = vpack.c.bf16 %v1218_v33, %v1217_v32  ;;  %v1381_v32 = vld [vmem:[%s2040_s11 + $0x60] sm:$0xff]  ;;  %v1382_v33 = vld [vmem:[%s2040_s11 + $0x68] sm:$0xff] }
 0x3ff   : > { %v611_v38 = vmul.f32 1.442695, %v610_v37 }
 0x400   : > { %v867_v47 = vpop.permute.xlu1 %866 }
 0x401   : > { %1677 = vpow2.f32 %v611_v38 }
 0x40b   : > { %v1678_v39 = vpop.eup %1677 }
 0x40c   : > { %v613_v40 = vsel %vm606_vm5, %v1678_v39, 0.0 }
 0x40d   : > { %614 = vadd.xlane.f32.xlu0 %v613_v40 }
 0x423   : > { %864 = vrot.lane.b32.xlu0 %v1845_v26, %s1712_s19  ;;  %s1718_s19 = smov 8  }
 0x427   : > { %1033 = vrot.lane.b32.xlu0 %v1845_v26, %s1713_s20  ;;  %s1719_s20 = smov 16  }
 0x42b   : > { %1031 = vrot.lane.b32.xlu0 %v1845_v26, %s1714_s21  ;;  %s1720_s21 = smov 24  }
 0x49a   : > { %v615_v43 = vpop.xlane.xlu0 %614 }
 0x49b   : > { %1679 = vrcp.f32 %v615_v43 }
 0x49e   : > { %v865_v46 = vpop.permute.xlu0 %864 }
 0x4a2   : > { %v1034_v48 = vpop.permute.xlu0 %1033 }
 0x4a5   : > { %v1680_v44 = vpop.eup %1679 }
 0x4a6   : > { %v617_v45 = vmul.f32 %v1680_v44, %v1678_v39  ;;  %v1032_v49 = vpop.permute.xlu0 %1031 }
 0x4a8   : > { %1583 = vmatmul.mubr.msk.f32.vlgmr.msra.gmra.mrb[0].mxu1 %vm620_vm6, %v617_v45 }
 0x4a9   : > { %1586 = vmatpush3.xpose.msk.msra.mxu1 %vm530_vm3, %v700_v41  ;;  %1587 = vmatprep.mubr.msk.f32.mxu1 %vm1706_vm1, %v1705_v10 }
 0x4aa   : > { %1595 = vmatprep.subr.mxu1 %v1705_v10 }
 0x4ac   : > { %1588 = vmatmul.mubr.msk.f32.vlgmr.msra.gmra.mrb[2].mxu1 %vm530_vm3, %v698_v42 }
 0x4ad   : > { %1596 = vmatpush3.xpose.msk.msra.mxu1 %vm530_vm3, %v867_v47  ;;  %1597 = vmatprep.mubr.msk.f32.mxu1 %vm1706_vm1, %v1705_v10 }
 0x4ae   : > { %1605 = vmatprep.subr.mxu1 %v1705_v10 }
 0x4b0   : > { %1598 = vmatmul.mubr.msk.f32.vlgmr.msra.gmra.mrb[4].mxu1 %vm530_vm3, %v865_v46 }
 0x4b1   : > { %1606 = vmatpush3.xpose.msk.msra.mxu1 %vm530_vm3, %v1034_v48  ;;  %1607 = vmatprep.mubr.msk.f32.mxu1 %vm1706_vm1, %v1705_v10 }
 0x4b2   : > { %1631 = vmatprep.subr.bf16.mxu1 %v1705_v10 }
 0x4b4   : > { %1608 = vmatmul.mubr.msk.f32.vlgmr.msra.gmra.mrb[6].mxu1 %vm530_vm3, %v1032_v49  ;;  %v1525_v49 = vld [vmem:[%s2035_s6] ss:$0 sm:$0xff] }
 0x4b5   : > { %1647 = vmatprep.mubr.msk.bf16.mxu1 %vm1706_vm1, %v1705_v10 }
 0x57b   : > { %v1883_v50 = vpop.f32.mrb[0].mxu1 }
 0x57c   : > { %v1584_v51 = vpop.f32.mrb[1].mxu1 }
 0x57f   : > { %v771_v52 = vpop.f32.mrb[2].mxu1 }
 0x580   : > { %v775_v53 = vmul.f32 0.35355338, %v771_v52  ;;  %v1589_v54 = vpop.f32.mrb[3].mxu1 }
 0x582   : > { %v776_v55 = vsel %vm606_vm5, %v775_v53, -inf }
 0x583   : > { %777 = vmax.xlane.f32.xlu0 %v776_v55  ;;  %v938_v56 = vpop.f32.mrb[4].mxu1 }
 0x584   : > { %v942_v57 = vmul.f32 0.35355338, %v938_v56  ;;  %v1599_v58 = vpop.f32.mrb[5].mxu1 }
 0x586   : > { %v943_v59 = vsel %vm606_vm5, %v942_v57, -inf }
 0x587   : > { %944 = vmax.xlane.f32.xlu1 %v943_v59  ;;  %v1105_v60 = vpop.f32.mrb[6].mxu1 }
 0x588   : > { %v1109_v61 = vmul.f32 0.35355338, %v1105_v60  ;;  %v1609_v62 = vpop.f32.mrb[7].mxu1 }
 0x58a   : > { %v1110_v63 = vsel %vm606_vm5, %v1109_v61, -inf }
 0x58b   : > { %1111 = vmax.xlane.f32.xlu0 %v1110_v63  ;;  %v1305_v63 = vld [vmem:[%s2038_s9 + $0x10] sm:$0xff] }
 0x598   : > { %954 = vrot.lane.b32.xlu1 %v1845_v26, %s1715_s22 }
 0x610   : > { %v778_v1 = vpop.xlane.xlu0 %777 }
 0x611   : > { %v779_v2 = vsub.f32 %v775_v53, %v778_v1  ;;  %v1306_v1 = vld [vmem:[%s2038_s9 + $0x18] sm:$0xff] }
 0x613   : > { %v780_v3 = vmul.f32 1.442695, %v779_v2  ;;  %v1309_v2 = vpack.c.bf16 %v1306_v1, %v1305_v63 }
 0x614   : > { %v945_v4 = vpop.xlane.xlu1 %944 }
 0x615   : > { %1681 = vpow2.f32 %v780_v3  ;;  %v946_v5 = vsub.f32 %v942_v57, %v945_v4 }
 0x617   : > { %v947_v6 = vmul.f32 1.442695, %v946_v5 }
 0x618   : > { %v1112_v7 = vpop.xlane.xlu0 %1111  ;;  %v955_v18 = vpop.permute.xlu1 %954 }
 0x619   : > { %1683 = vpow2.f32 %v947_v6  ;;  %v1113_v8 = vsub.f32 %v1109_v61, %v1112_v7  ;;  %v1304_v61 = vld [vmem:[%s2038_s9 + $0x8] sm:$0xff]  ;;  %v1526_v7 = vld [vmem:[%s2036_s7] ss:$0 sm:$0xff] }
 0x61b   : > { %v1114_v9 = vmul.f32 1.442695, %v1113_v8 }
 0x61d   : > { %1685 = vpow2.f32 %v1114_v9  ;;  %v1527_v9 = vld [vmem:[%s2037_s8] ss:$0 sm:$0xff] }
 0x61f   : > { %v1682_v11 = vpop.eup %1681 }
 0x620   : > { %v782_v12 = vsel %vm606_vm5, %v1682_v11, 0.0 }
 0x621   : > { %783 = vadd.xlane.f32.xlu0 %v782_v12 }
 0x623   : > { %v1684_v13 = vpop.eup %1683 }
 0x624   : > { %v949_v14 = vsel %vm606_vm5, %v1684_v13, 0.0 }
 0x625   : > { %950 = vadd.xlane.f32.xlu0 %v949_v14  ;;  %v1369_v14 = vld [vmem:[%s2040_s11] sm:$0xff] }
 0x627   : > { %v1686_v15 = vpop.eup %1685 }
 0x628   : > { %v1116_v16 = vsel %vm606_vm5, %v1686_v15, 0.0 }
 0x629   : > { %1117 = vadd.xlane.f32.xlu1 %v1116_v16 }
 0x63a   : > { %1121 = vrot.lane.b32.xlu1 %v1845_v26, %s1716_s23 }
 0x63b   : > { %787 = vrot.lane.b32.xlu0 %v1845_v26, %s1717_s24 }
 0x6ae   : > { %v784_v17 = vpop.xlane.xlu0 %783 }
 0x6af   : > { %1687 = vrcp.f32 %v784_v17  ;;  %v1371_v17 = vld [vmem:[%s2040_s11 + $0x10] sm:$0xff] }
 0x6b2   : > { %v951_v19 = vpop.xlane.xlu0 %950 }
 0x6b3   : > { %1689 = vrcp.f32 %v951_v19 }
 0x6b6   : > { %v1118_v20 = vpop.xlane.xlu1 %1117  ;;  %v788_v21 = vpop.permute.xlu0 %787 }
 0x6b7   : > { %1691 = vrcp.f32 %v1118_v20  ;;  %1591 = vmatpush3.msk.msra.mxu0 %vm624_vm4, %v788_v21  ;;  %v1373_v20 = vld [vmem:[%s2040_s11 + $0x20] sm:$0xff]  ;;  %v1374_v21 = vld [vmem:[%s2040_s11 + $0x28] sm:$0xff] }
 0x6b8   : > { %1600 = vmatprep.subr.mxu0 %v1705_v10 }
 0x6b9   : > { %v1688_v22 = vpop.eup %1687 }
 0x6ba   : > { %v786_v23 = vmul.f32 %v1688_v22, %v1682_v11  ;;  %v1122_v26 = vpop.permute.xlu1 %1121  ;;  %v1388_v22 = vpack.c.bf16 %v1374_v21, %v1373_v20 }
 0x6bc   : > { %1593 = vmatmul.mubr.msk.f32.vlgmr.msra.gmra.mrb[6].mxu0 %vm620_vm6, %v786_v23  ;;  %v1375_v23 = vld [vmem:[%s2040_s11 + $0x30] sm:$0xff] }
 0x6bd   : > { %v1690_v24 = vpop.eup %1689  ;;  %1601 = vmatpush3.msk.msra.mxu0 %vm624_vm4, %v955_v18  ;;  %1602 = vmatprep.mubr.msk.f32.mxu0 %vm1706_vm1, %v1705_v10  ;;  %v1372_v18 = vld [vmem:[%s2040_s11 + $0x18] sm:$0xff] }
 0x6be   : > { %v953_v25 = vmul.f32 %v1690_v24, %v1684_v13  ;;  %1610 = vmatprep.subr.mxu0 %v1705_v10  ;;  %v1387_v19 = vpack.c.bf16 %v1372_v18, %v1371_v17  ;;  %v1376_v24 = vld [vmem:[%s2040_s11 + $0x38] sm:$0xff] }
 0x6c0   : > { %1603 = vmatmul.mubr.msk.f32.vlgmr.msra.gmra.mrb[8].mxu0 %vm620_vm6, %v953_v25  ;;  %v1389_v25 = vpack.c.bf16 %v1376_v24, %v1375_v23 }
 0x6c1   : > { %v1692_v27 = vpop.eup %1691  ;;  %1611 = vmatpush3.msk.msra.mxu0 %vm624_vm4, %v1122_v26  ;;  %1612 = vmatprep.mubr.msk.f32.mxu0 %vm1706_vm1, %v1705_v10  ;;  %v1377_v26 = vld [vmem:[%s2040_s11 + $0x40] sm:$0xff] }
 0x6c2   : > { %v1120_v28 = vmul.f32 %v1692_v27, %v1686_v15  ;;  %1615 = vmatprep.subr.bf16.mxu0 %v1705_v10  ;;  %v1370_v15 = vld [vmem:[%s2040_s11 + $0x8] sm:$0xff] }
 0x6c3   : > { %v1386_v16 = vpack.c.bf16 %v1370_v15, %v1369_v14  ;;  %v1378_v27 = vld [vmem:[%s2040_s11 + $0x48] sm:$0xff] }
 0x6c4   : > { %1613 = vmatmul.mubr.msk.f32.vlgmr.msra.gmra.mrb[10].mxu0 %vm620_vm6, %v1120_v28  ;;  %v1390_v28 = vpack.c.bf16 %v1378_v27, %v1377_v26 }
 0x6c5   : > { %1619 = vmatprep.mubr.msk.bf16.mxu0 %vm1706_vm1, %v1705_v10  ;;  %1616 = vmatpush3.bf16.msra.mxu0 %v1220_v31  ;;  %v1391_v31 = vpack.c.bf16 %v1380_v30, %v1379_v29 }
 0x6c6   : > { %1617 = vmatprep.subr.bf16.mxu0 %v1705_v10  ;;  %1632 = vmatpush3.bf16.msra.mxu1 %v1386_v16 }
 0x6c7   : > { %1633 = vmatprep.subr.bf16.mxu1 %v1705_v10 }
 0x6c9   : > { %1618 = vmatpush3.bf16.msra.mxu0 %v1221_v34  ;;  %v1392_v34 = vpack.c.bf16 %v1382_v33, %v1381_v32 }
 0x6ca   : > { %1623 = vmatprep.subr.bf16.mxu0 %v1705_v10  ;;  %1634 = vmatpush3.bf16.msra.mxu1 %v1387_v19 }
 0x6cb   : > { %1635 = vmatprep.subr.bf16.mxu1 %v1705_v10 }
 0x6ce   : > { %1636 = vmatpush3.bf16.msra.mxu1 %v1388_v22 }
 0x6cf   : > { %1637 = vmatprep.subr.bf16.mxu1 %v1705_v10 }
 0x6d2   : > { %1638 = vmatpush3.bf16.msra.mxu1 %v1389_v25 }
 0x6d3   : > { %1639 = vmatprep.subr.bf16.mxu1 %v1705_v10 }
 0x6d6   : > { %1640 = vmatpush3.bf16.msra.mxu1 %v1390_v28 }
 0x6d7   : > { %1641 = vmatprep.subr.bf16.mxu1 %v1705_v10 }
 0x6da   : > { %1642 = vmatpush3.bf16.msra.mxu1 %v1391_v31 }
 0x6db   : > { %1643 = vmatprep.subr.bf16.mxu1 %v1705_v10 }
 0x6de   : > { %1644 = vmatpush3.bf16.msra.mxu1 %v1392_v34 }
 0x6df   : > { %1645 = vmatprep.subr.bf16.mxu1 %v1705_v10 }
 0x78f   : > { %v860_v35 = vpop.f32.mrb[6].mxu0 }
 0x790   : > { %1199 = vrot.lane.b32.xlu1 %v860_v35, %s1718_s19  ;;  %v1594_v36 = vpop.f32.mrb[7].mxu0  ;;  %v1383_v35 = vld [vmem:[%s2040_s11 + $0x70] sm:$0xff] }
 0x791   : > { %v1384_v36 = vld [vmem:[%s2040_s11 + $0x78] sm:$0xff] }
 0x793   : > { %v1027_v37 = vpop.f32.mrb[8].mxu0 }
 0x794   : > { %1203 = vrot.lane.b32.xlu0 %v1027_v37, %s1719_s20  ;;  %v1604_v38 = vpop.f32.mrb[9].mxu0  ;;  %v1393_v37 = vpack.c.bf16 %v1384_v36, %v1383_v35 }
 0x795   : > { %v1528_v38 = vld [vmem:[%s2039_s10] ss:$0 sm:$0xff] }
 0x796   : > { %1646 = vmatpush3.bf16.msra.mxu1 %v1393_v37 }
 0x797   : > { %v1194_v39 = vpop.f32.mrb[10].mxu0 }
 0x798   : > { %1207 = vrot.lane.b32.xlu1 %v1194_v39, %s1720_s21  ;;  %v1614_v40 = vpop.f32.mrb[11].mxu0 }
 0x802   : > { %v1200_v41 = vpop.permute.xlu1 %1199 }
 0x803   : > { %v1210_v43 = vsel %vm530_vm3, %v1883_v50, %v1200_v41 }
 0x806   : > { %v1204_v42 = vpop.permute.xlu0 %1203 }
 0x807   : > { %v1212_v44 = vsel %vm1211_vm7, %v1210_v43, %v1204_v42 }
 0x80a   : > { %v1208_v45 = vpop.permute.xlu1 %1207 }
 0x80b   : > { %v1214_v46 = vsel %vm1213_vm8, %v1212_v44, %v1208_v45 }
 0x80c   : > { %v1219_v47 = vpack.c.bf16 %v1214_v46, %v1214_v46 }
 0x80e   : > { %1620 = vmatmul.mubr.msk.bf16.vlgmr.msra.gmra.mrb[12].mxu0 %vm483_vm2, %v1219_v47 }
 0x80f   : > { %1627 = vmatprep.mubr.msk.bf16.mxu0 %vm1706_vm1, %v1705_v10 }
 0x8e1   : > { %v1259_v48 = vpop.f32.mrb[12].mxu0 }
 0x8e2   : > { %v1265_v51 = vadd.f32 %v1259_v48, %v1807_v0  ;;  %v1621_v52 = vpop.f32.mrb[13].mxu0  ;;  %v1303_v0 = vld [vmem:[%s2038_s9] sm:$0xff] }
 0x8e3   : > { %v1262_v53 = vpop.f32.mrb[14].mxu0  ;;  %v1308_v62 = vpack.c.bf16 %v1304_v61, %v1303_v0 }
 0x8e4   : > { %v1932_v54 = vadd.f32 %v1525_v49, %v1265_v51  ;;  %v1622_v50 = vpop.f32.mrb[15].mxu0 }
 0x8e5   : > { %1624 = vmatpush3.bf16.msra.mxu0 %v1308_v62 }
 0x8e6   : > { %v1276_v55 = vsel %vm440_vm0, %v1932_v54, 0.0  ;;  %1625 = vmatprep.subr.bf16.mxu0 %v1705_v10 }
 0x8e7   : > { %1277 = vadd.xlane.f32.xlu0 %v1276_v55  ;;  %v1530_v55 = vld [vmem:[%s2041_s12] ss:$0 sm:$0xff] }
 0x8e9   : > { %1626 = vmatpush3.bf16.msra.mxu0 %v1309_v2 }
 0x974   : > { %v1278_v56 = vpop.xlane.xlu0 %1277 }
 0x975   : > { %v1279_v57 = vmul.f32 0.03125, %v1278_v56 }
 0x977   : > { %v1280_v58 = vsub.f32 %v1932_v54, %v1279_v57 }
 0x979   : > { %v1281_v59 = vmul.f32 %v1280_v58, %v1280_v58 }
 0x97b   : > { %v1282_v60 = vsel %vm440_vm0, %v1281_v59, 0.0 }
 0x97c   : > { %1283 = vadd.xlane.f32.xlu1 %v1282_v60 }
 0xa09   : > { %v1284_v3 = vpop.xlane.xlu1 %1283 }
 0xa0a   : > { %v1285_v4 = vmul.f32 0.03125, %v1284_v3 }
 0xa0c   : > { %v1286_v5 = vadd.f32 1e-06, %v1285_v4 }
 0xa0e   : > { %1693 = vrsqrt.f32 %v1286_v5 }
 0xa18   : > { %v1694_v6 = vpop.eup %1693 }
 0xa19   : > { %v1288_v8 = vmul.f32 %v1694_v6, %v1280_v58 }
 0xa1b   : > { %v1295_v11 = vmul.f32 %v1526_v7, %v1288_v8 }
 0xa1d   : > { %v1302_v12 = vadd.f32 %v1527_v9, %v1295_v11 }
 0xa1f   : > { %v1307_v13 = vpack.c.bf16 %v1302_v12, %v1302_v12 }
 0xa21   : > { %1628 = vmatmul.mubr.msk.bf16.vlgmr.msra.gmra.mrb[16].mxu0 %vm483_vm2, %v1307_v13 }
 0xaf4   : > { %v1354_v39 = vpop.f32.mrb[16].mxu0 }
 0xaf5   : > { %v1355_v40 = vadd.f32 %v1528_v38, %v1354_v39  ;;  %v1629_v41 = vpop.f32.mrb[17].mxu0 }
 0xaf6   : > { %v1357_v42 = vpop.f32.mrb[18].mxu0 }
 0xaf7   : > { %v1360_v43 = vmul.f32 %v1355_v40, %v1355_v40  ;;  %v1630_v44 = vpop.f32.mrb[19].mxu0 }
 0xaf9   : > { %v1361_v45 = vmul.f32 %v1360_v43, %v1355_v40 }
 0xafb   : > { %v1362_v46 = vmul.f32 0.044715, %v1361_v45 }
 0xafd   : > { %v1363_v47 = vadd.f32 %v1362_v46, %v1355_v40 }
 0xaff   : > { %v1364_v48 = vmul.f32 0.7978846, %v1363_v47 }
 0xb01   : > { %1695 = vtanh.f32 %v1364_v48 }
 0xb0b   : > { %v1696_v49 = vpop.eup %1695 }
 0xb0c   : > { %v1366_v51 = vadd.f32 1.0, %v1696_v49 }
 0xb0e   : > { %v1367_v10 = vmul.f32 0.5, %v1366_v51 }
 0xb10   : > { %v1368_v52 = vmul.f32 %v1367_v10, %v1355_v40 }
 0xb12   : > { %v1385_v53 = vpack.c.bf16 %v1368_v52, %v1368_v52 }
 0xb14   : > { %1648 = vmatmul.mubr.bf16.vlgmr.msra.gmra.mrb[8].mxu1 %v1385_v53 }
 0xbe7   : > { %v1428_v50 = vpop.f32.mrb[8].mxu1 }
 0xbe8   : > { %v1434_v56 = vadd.f32 %v1428_v50, %v1932_v54  ;;  %v1649_v57 = vpop.f32.mrb[9].mxu1 }
 0xbe9   : > { %v1431_v58 = vpop.f32.mrb[10].mxu1 }
 0xbea   : > { %v1442_v59 = vadd.f32 %v1530_v55, %v1434_v56  ;;  %v1650_v60 = vpop.f32.mrb[11].mxu1 }
 0xbec   : > { %1443 = vst.msk [vmem:[%s435_s18] sm:$0x1f] %vm440_vm0, %v1442_v59 }
 0xbed PF: > { %s23_s25 = sadd.s32 1, %s1703_s25  }
 0xbee   : > { %p20_p4 = scmp.ge.s32.totalorder %s23_s25, 4  }
 0xbf0   :  { %22 = sbr.rel (!%p20_p4) target bundleno = 1 (0x1), region = 102 }

</bundles_post_ra>
